<compile_context>
chip_gen: v5e
topology: v5e:2x2
jax: 0.10.0
libtpu: 0.0.40
codegen_flags: <defaults>
</compile_context>

<pallas_src>
import functools

import jax
import jax.numpy as jnp
from jax.experimental import pallas as pl
from jax.experimental.pallas import tpu as pltpu


def _rnn_seq_kernel(x_ref, wih_ref, whh_ref, bih_ref, bhn_ref, out_ref, gx_ref,
                    *, cell_type, n_dirs):
    """One fused recurrent sweep (both directions at once when bi_dir).

    x_ref   : (T*B, n_dirs*D)   time-major rows; for bi_dir the lane slab
                                [D:2D] of row (t, b) holds x[T-1-t, b] so both
                                directions read the same gx row per step.
    wih_ref : (G, n_dirs*D, NH) gate-major input->gate weights, block-structured
                                over directions (off-blocks are zero).
    whh_ref : (G, NH, NH)       gate-major hidden->gate weights, block-diagonal
                                over directions.  f32, VMEM resident.
    bih_ref : (G, 1, NH)        input-side bias; b_hh folded in for LSTM and
                                for the GRU r/z gates.
    bhn_ref : (1, NH)           GRU n-gate hidden bias (multiplied by r).
    out_ref : (T, B, NH)        per-timestep hidden state(s), direction-concat
                                and dtype cast done here.
    gx_ref  : (G, T*B, NH)      VMEM scratch: hoisted input projection.
    """
    T, B, NH = out_ref.shape
    H = NH // n_dirs
    G = gx_ref.shape[0]

    # ---- Phase 1 (off the serial path): one MXU matmul per gate over ALL
    # timesteps and both directions at once. ----
    xv = x_ref[...]
    for g in range(G):
        gx_ref[g] = (jnp.dot(xv, wih_ref[g], preferred_element_type=jnp.float32)
                     + bih_ref[g])

    whh = whh_ref[...]                                    # (G, NH, NH), f32
    bhn = bhn_ref[...] if cell_type != "lstm" else None   # (1, NH)

    # ---- Phase 2: serial recurrence; h (and c) live in vregs as carries. ----
    def step(t, carry):
        h = carry[0]
        row = pl.multiple_of(t * B, B)          # B == 8 -> sublane-aligned load
        gx = [gx_ref[g, pl.ds(row, B), :] for g in range(G)]      # (B, NH) each
        gh = [jnp.dot(h, whh[g], preferred_element_type=jnp.float32)
              for g in range(G)]                                   # (B, NH) each
        if cell_type == "lstm":
            # PyTorch LSTMCell, gate order (i, f, g, o); both biases pre-folded.
            c = carry[1]
            i_g = jax.nn.sigmoid(gx[0] + gh[0])
            f_g = jax.nn.sigmoid(gx[1] + gh[1])
            g_g = jnp.tanh(gx[2] + gh[2])
            o_g = jax.nn.sigmoid(gx[3] + gh[3])
            c = f_g * c + i_g * g_g
            h = o_g * jnp.tanh(c)
            new_carry = (h, c)
        else:
            # PyTorch GRUCell, gate order (r, z, n); b_hr/b_hz folded into gx,
            # only b_hn stays on the hidden projection (r multiplies it).
            r = jax.nn.sigmoid(gx[0] + gh[0])
            z = jax.nn.sigmoid(gx[1] + gh[1])
            n = jnp.tanh(gx[2] + r * (gh[2] + bhn))
            h = (1.0 - z) * n + z * h
            new_carry = (h,)

        hh = h.astype(out_ref.dtype)
        if n_dirs == 1:
            out_ref[t] = hh
        else:
            # Forward half belongs to time t, backward half to time T-1-t:
            # the concat over directions happens right here in the stores.
            out_ref[t, :, :H] = hh[:, :H]
            out_ref[T - 1 - t, :, H:] = hh[:, H:]
        return new_carry

    h0 = jnp.zeros((B, NH), jnp.float32)
    carry0 = (h0, jnp.zeros((B, NH), jnp.float32)) if cell_type == "lstm" else (h0,)
    jax.lax.fori_loop(0, T, step, carry0, unroll=True)


def init_rnn_params(key, input_dim, out_dim, cell_type="gru", bi_dir=False,
                    dtype=jnp.float32):
    """nn.LSTMCell / nn.GRUCell shapes.  LSTM gates (i,f,g,o); GRU gates (r,z,n)."""
    hidden = out_dim // 2 if bi_dir else out_dim
    gate_mult = 4 if cell_type == "lstm" else 3
    n_dirs = 2 if bi_dir else 1
    keys = jax.random.split(key, 4 * n_dirs)
    names = ["f"] + (["b"] if bi_dir else [])
    k = 1.0 / float(hidden) ** 0.5
    params = {}
    for d, name in enumerate(names):
        kw_ih, kw_hh, kb_ih, kb_hh = keys[4 * d:4 * d + 4]
        params[name] = {
            "w_ih": jax.random.uniform(kw_ih, (gate_mult * hidden, input_dim), dtype, -k, k),
            "w_hh": jax.random.uniform(kw_hh, (gate_mult * hidden, hidden), dtype, -k, k),
            "b_ih": jax.random.uniform(kb_ih, (gate_mult * hidden,), dtype, -k, k),
            "b_hh": jax.random.uniform(kb_hh, (gate_mult * hidden,), dtype, -k, k),
        }
    return params


@functools.partial(jax.jit, static_argnames=("bi_dir", "cell_type", "compute_dtype"))
def rnn_forward(x, params, bi_dir=False, cell_type="gru", compute_dtype=None):
    """Batch-mode RNN forward:  x (T, B, input_dim) -> (T, B, out_dim)."""
    T, B, D = x.shape
    names = ["f"] + (["b"] if bi_dir else [])
    n_dirs = len(names)
    H = params["f"]["w_hh"].shape[1]
    G = 4 if cell_type == "lstm" else 3
    NH = n_dirs * H
    ND = n_dirs * D
    cd = jnp.dtype(compute_dtype) if compute_dtype is not None else x.dtype

    # --- Gate-major, direction-fused parameter blocks (built at trace time).
    # TODO(synk): in a full model, precompute these once per layer, not per call.
    wih = jnp.zeros((G, ND, NH), jnp.float32)    # block-structured over dirs
    whh = jnp.zeros((G, NH, NH), jnp.float32)    # block-diagonal over dirs
    bih = jnp.zeros((G, NH), jnp.float32)
    bhn = jnp.zeros((NH,), jnp.float32)
    for d, name in enumerate(names):
        p = params[name]
        w_ih = p["w_ih"].astype(jnp.float32)     # (G*H, D)
        w_hh = p["w_hh"].astype(jnp.float32)     # (G*H, H)
        b_ih = p["b_ih"].astype(jnp.float32)
        b_hh = p["b_hh"].astype(jnp.float32)
        dsl, hsl = slice(d * D, (d + 1) * D), slice(d * H, (d + 1) * H)
        for g in range(G):
            rows = slice(g * H, (g + 1) * H)
            wih = wih.at[g, dsl, hsl].set(w_ih[rows].T)
            whh = whh.at[g, hsl, hsl].set(w_hh[rows].T)
            if cell_type == "lstm" or g < 2:
                # LSTM: both biases fold.  GRU r/z: b_hr/b_hz fold too.
                bih = bih.at[g, hsl].set(b_ih[rows] + b_hh[rows])
            else:
                # GRU n gate: only b_in folds (b_hn is multiplied by r).
                bih = bih.at[g, hsl].set(b_ih[rows])
        if cell_type != "lstm":
            bhn = bhn.at[hsl].set(b_hh[2 * H:3 * H])

    # bf16 only where it helps (the hoisted phase-1 MXU matmul).  The serial
    # recurrence keeps h / W_hh / gate math in f32: no per-step casts and no
    # compounding rounding error.  On v5e just leave compute_dtype=None.
    wih = wih.astype(cd)
    bih = bih[:, None, :]                         # (G, 1, NH)
    bhn = bhn[None, :]                            # (1, NH)

    if bi_dir:
        # Lane slab [D:2D] of row (t, b) holds x[T-1-t, b] so the fused
        # backward sweep consumes the right timestep at loop index t.
        x2 = jnp.concatenate([x, x[::-1]], axis=-1).reshape(T * B, ND)
    else:
        x2 = x.reshape(T * B, D)
    x2 = x2.astype(cd)

    out = pl.pallas_call(
        functools.partial(_rnn_seq_kernel, cell_type=cell_type, n_dirs=n_dirs),
        out_shape=jax.ShapeDtypeStruct((T, B, NH), x.dtype),
        grid_spec=pltpu.PrefetchScalarGridSpec(
            num_scalar_prefetch=0,
            grid=(1,),
            in_specs=[
                pl.BlockSpec((T * B, ND), lambda i: (0, 0)),       # x (+ reversed copy)
                pl.BlockSpec((G, ND, NH), lambda i: (0, 0, 0)),    # W_ih blocks
                pl.BlockSpec((G, NH, NH), lambda i: (0, 0, 0)),    # W_hh block-diag
                pl.BlockSpec((G, 1, NH), lambda i: (0, 0, 0)),     # folded input bias
                pl.BlockSpec((1, NH), lambda i: (0, 0)),           # GRU b_hn
            ],
            out_specs=pl.BlockSpec((T, B, NH), lambda i: (0, 0, 0)),
            scratch_shapes=[pltpu.VMEM((G, T * B, NH), jnp.float32)],  # hoisted gx
        ),
        compiler_params=pltpu.CompilerParams(
            dimension_semantics=("arbitrary",)),
    )(x2, wih, whh, bih, bhn)
    # Bi-dir concat and the dtype cast both already happened inside the kernel.
    return out


def _reference_forward(x, params, bi_dir=False, cell_type="gru"):
    """Pure-JAX reference (scan) for correctness checking."""
    def run(p, xs, reverse):
        H = p["w_hh"].shape[1]
        T, B, _ = xs.shape
        if reverse:
            xs = xs[::-1]

        def step(carry, x_t):
            h, c = carry
            gi = x_t @ p["w_ih"].T + p["b_ih"]
            gh = h @ p["w_hh"].T + p["b_hh"]
            if cell_type == "lstm":
                g = gi + gh
                i_g = jax.nn.sigmoid(g[:, 0 * H:1 * H])
                f_g = jax.nn.sigmoid(g[:, 1 * H:2 * H])
                g_g = jnp.tanh(g[:, 2 * H:3 * H])
                o_g = jax.nn.sigmoid(g[:, 3 * H:4 * H])
                c = f_g * c + i_g * g_g
                h = o_g * jnp.tanh(c)
            else:
                r = jax.nn.sigmoid(gi[:, 0 * H:1 * H] + gh[:, 0 * H:1 * H])
                z = jax.nn.sigmoid(gi[:, 1 * H:2 * H] + gh[:, 1 * H:2 * H])
                n = jnp.tanh(gi[:, 2 * H:3 * H] + r * gh[:, 2 * H:3 * H])
                h = (1.0 - z) * n + z * h
            return (h, c), h

        h0 = jnp.zeros((B, H), x.dtype)
        c0 = jnp.zeros((B, H), x.dtype)
        _, hs = jax.lax.scan(step, (h0, c0), xs)
        if reverse:
            hs = hs[::-1]
        return hs

    out = run(params["f"], x, False)
    if bi_dir:
        out = jnp.concatenate((out, run(params["b"], x, True)), axis=2)
    return out


if __name__ == "__main__":
    T, B = 8, 8
    INPUT_DIM, OUT_DIM = 16, 32

    key = jax.random.PRNGKey(0)
    kx, kpg, kpl_, kpb = jax.random.split(key, 4)
    x = jax.random.normal(kx, (T, B, INPUT_DIM), jnp.float32)

    # TPU MXU f32 matmuls at default precision can differ by ~1e-3 between the
    # Pallas kernel and the XLA reference; real bugs show up as O(0.1) errors.
    TOL = dict(atol=2e-3, rtol=2e-3)

    # 1) GRU cell (MotionGRU uses rnn_type='gru'), uni-directional (x_birnn=False).
    p_gru = init_rnn_params(kpg, INPUT_DIM, OUT_DIM, cell_type="gru")
    out = jax.block_until_ready(rnn_forward(x, p_gru, cell_type="gru"))
    ref = _reference_forward(x, p_gru, cell_type="gru")
    assert out.shape == (T, B, OUT_DIM), out.shape
    assert jnp.allclose(out, ref, **TOL), float(jnp.abs(out - ref).max())

    # 2) LSTM cell path of the same RNN class (cell_type='lstm').
    p_lstm = init_rnn_params(kpl_, INPUT_DIM, OUT_DIM, cell_type="lstm")
    out = jax.block_until_ready(rnn_forward(x, p_lstm, cell_type="lstm"))
    ref = _reference_forward(x, p_lstm, cell_type="lstm")
    assert jnp.allclose(out, ref, **TOL), float(jnp.abs(out - ref).max())

    # 3) Bi-directional: both sweeps fused into ONE recurrence (T serial steps),
    #    direction-concat produced inside the kernel's output stores.
    p_bi = init_rnn_params(kpb, INPUT_DIM, OUT_DIM, cell_type="gru", bi_dir=True)
    out = jax.block_until_ready(rnn_forward(x, p_bi, bi_dir=True, cell_type="gru"))
    ref = _reference_forward(x, p_bi, bi_dir=True, cell_type="gru")
    assert out.shape == (T, B, OUT_DIM), out.shape
    assert jnp.allclose(out, ref, **TOL), float(jnp.abs(out - ref).max())

    # 4) bf16 compute path: only the hoisted input projection runs in bf16,
    #    recurrence stays f32 (skip bf16 entirely on v5e).
    out = jax.block_until_ready(
        rnn_forward(x, p_gru, cell_type="gru", compute_dtype=jnp.bfloat16))
    ref = _reference_forward(x, p_gru, cell_type="gru")
    assert jnp.allclose(out, ref, atol=5e-2, rtol=5e-2), float(jnp.abs(out - ref).max())

    print("KERNEL_OK")
</pallas_src>

<mosaic_0001>
module attributes {stable_mosaic.version = 11 : i64} {
  func.func @_rnn_seq_kernel(%arg0: i32, %arg1: memref<64x16xf32, #tpu.memory_space<vmem>>, %arg2: memref<3x16x32xf32, #tpu.memory_space<vmem>>, %arg3: memref<3x32x32xf32, #tpu.memory_space<vmem>>, %arg4: memref<3x1x32xf32, #tpu.memory_space<vmem>>, %arg5: memref<1x32xf32, #tpu.memory_space<vmem>>, %arg6: memref<8x8x32xf32, #tpu.memory_space<vmem>>, %arg7: memref<3x64x32xf32, #tpu.memory_space<vmem>>) attributes {dimension_semantics = [#tpu.dimension_semantics<arbitrary>], iteration_bounds = array<i64: 1>, scalar_prefetch = 0 : i64, scratch_operands = 1 : i64, tpu.core_type = #tpu.core_type<tc>, window_params = [{pipeline_mode = #tpu.pipeline_mode<synchronous>, transform_indices = @transform_0, window_bounds = array<i64: 64, 16>}, {pipeline_mode = #tpu.pipeline_mode<synchronous>, transform_indices = @transform_1, window_bounds = array<i64: 3, 16, 32>}, {pipeline_mode = #tpu.pipeline_mode<synchronous>, transform_indices = @transform_2, window_bounds = array<i64: 3, 32, 32>}, {pipeline_mode = #tpu.pipeline_mode<synchronous>, transform_indices = @transform_3, window_bounds = array<i64: 3, 1, 32>}, {pipeline_mode = #tpu.pipeline_mode<synchronous>, transform_indices = @transform_4, window_bounds = array<i64: 1, 32>}, {pipeline_mode = #tpu.pipeline_mode<synchronous>, transform_indices = @transform_5, window_bounds = array<i64: 8, 8, 32>}]} {
    %c0 = arith.constant 0 : index
    %c0_0 = arith.constant 0 : index
    %0 = vector.load %arg1[%c0, %c0_0] : memref<64x16xf32, #tpu.memory_space<vmem>>, vector<64x16xf32>
    %c0_1 = arith.constant 0 : index
    %c0_2 = arith.constant 0 : index
    %c0_3 = arith.constant 0 : index
    %1 = vector.load %arg2[%c0_1, %c0_2, %c0_3] : memref<3x16x32xf32, #tpu.memory_space<vmem>>, vector<1x16x32xf32>
    %2 = vector.shape_cast %1 : vector<1x16x32xf32> to vector<16x32xf32>
    %cst = arith.constant dense<0.000000e+00> : vector<64x32xf32>
    %3 = tpu.matmul %0, %2, %cst {dimension_numbers = #tpu.dot_dimension_numbers<[1], [0], [0], [1], [0, 0, 1, 1], [], []>} : vector<64x16xf32>, vector<16x32xf32>, vector<64x32xf32> -> vector<64x32xf32>
    %c0_4 = arith.constant 0 : index
    %c0_5 = arith.constant 0 : index
    %c0_6 = arith.constant 0 : index
    %4 = vector.load %arg4[%c0_4, %c0_5, %c0_6] : memref<3x1x32xf32, #tpu.memory_space<vmem>>, vector<1x1x32xf32>
    %5 = vector.shape_cast %4 : vector<1x1x32xf32> to vector<1x32xf32>
    %6 = vector.broadcast %5 : vector<1x32xf32> to vector<64x32xf32>
    %7 = arith.addf %3, %6 : vector<64x32xf32>
    %c0_7 = arith.constant 0 : index
    %c0_8 = arith.constant 0 : index
    %c0_9 = arith.constant 0 : index
    %8 = vector.load %arg7[%c0_7, %c0_8, %c0_9] : memref<3x64x32xf32, #tpu.memory_space<vmem>>, vector<1x64x32xf32>
    %9 = vector.shape_cast %8 : vector<1x64x32xf32> to vector<64x32xf32>
    %10 = vector.shape_cast %7 : vector<64x32xf32> to vector<1x64x32xf32>
    tpu.vector_store %arg7[%c0_7, %c0_8, %c0_9], %10 {strides = array<i32>} : memref<3x64x32xf32, #tpu.memory_space<vmem>>, vector<1x64x32xf32>,
    %c1 = arith.constant 1 : index
    %c0_10 = arith.constant 0 : index
    %c0_11 = arith.constant 0 : index
    %11 = vector.load %arg2[%c1, %c0_10, %c0_11] : memref<3x16x32xf32, #tpu.memory_space<vmem>>, vector<1x16x32xf32>
    %12 = vector.shape_cast %11 : vector<1x16x32xf32> to vector<16x32xf32>
    %cst_12 = arith.constant dense<0.000000e+00> : vector<64x32xf32>
    %13 = tpu.matmul %0, %12, %cst_12 {dimension_numbers = #tpu.dot_dimension_numbers<[1], [0], [0], [1], [0, 0, 1, 1], [], []>} : vector<64x16xf32>, vector<16x32xf32>, vector<64x32xf32> -> vector<64x32xf32>
    %c1_13 = arith.constant 1 : index
    %c0_14 = arith.constant 0 : index
    %c0_15 = arith.constant 0 : index
    %14 = vector.load %arg4[%c1_13, %c0_14, %c0_15] : memref<3x1x32xf32, #tpu.memory_space<vmem>>, vector<1x1x32xf32>
    %15 = vector.shape_cast %14 : vector<1x1x32xf32> to vector<1x32xf32>
    %16 = vector.broadcast %15 : vector<1x32xf32> to vector<64x32xf32>
    %17 = arith.addf %13, %16 : vector<64x32xf32>
    %c1_16 = arith.constant 1 : index
    %c0_17 = arith.constant 0 : index
    %c0_18 = arith.constant 0 : index
    %18 = vector.load %arg7[%c1_16, %c0_17, %c0_18] : memref<3x64x32xf32, #tpu.memory_space<vmem>>, vector<1x64x32xf32>
    %19 = vector.shape_cast %18 : vector<1x64x32xf32> to vector<64x32xf32>
    %20 = vector.shape_cast %17 : vector<64x32xf32> to vector<1x64x32xf32>
    tpu.vector_store %arg7[%c1_16, %c0_17, %c0_18], %20 {strides = array<i32>} : memref<3x64x32xf32, #tpu.memory_space<vmem>>, vector<1x64x32xf32>,
    %c2 = arith.constant 2 : index
    %c0_19 = arith.constant 0 : index
    %c0_20 = arith.constant 0 : index
    %21 = vector.load %arg2[%c2, %c0_19, %c0_20] : memref<3x16x32xf32, #tpu.memory_space<vmem>>, vector<1x16x32xf32>
    %22 = vector.shape_cast %21 : vector<1x16x32xf32> to vector<16x32xf32>
    %cst_21 = arith.constant dense<0.000000e+00> : vector<64x32xf32>
    %23 = tpu.matmul %0, %22, %cst_21 {dimension_numbers = #tpu.dot_dimension_numbers<[1], [0], [0], [1], [0, 0, 1, 1], [], []>} : vector<64x16xf32>, vector<16x32xf32>, vector<64x32xf32> -> vector<64x32xf32>
    %c2_22 = arith.constant 2 : index
    %c0_23 = arith.constant 0 : index
    %c0_24 = arith.constant 0 : index
    %24 = vector.load %arg4[%c2_22, %c0_23, %c0_24] : memref<3x1x32xf32, #tpu.memory_space<vmem>>, vector<1x1x32xf32>
    %25 = vector.shape_cast %24 : vector<1x1x32xf32> to vector<1x32xf32>
    %26 = vector.broadcast %25 : vector<1x32xf32> to vector<64x32xf32>
    %27 = arith.addf %23, %26 : vector<64x32xf32>
    %c2_25 = arith.constant 2 : index
    %c0_26 = arith.constant 0 : index
    %c0_27 = arith.constant 0 : index
    %28 = vector.load %arg7[%c2_25, %c0_26, %c0_27] : memref<3x64x32xf32, #tpu.memory_space<vmem>>, vector<1x64x32xf32>
    %29 = vector.shape_cast %28 : vector<1x64x32xf32> to vector<64x32xf32>
    %30 = vector.shape_cast %27 : vector<64x32xf32> to vector<1x64x32xf32>
    tpu.vector_store %arg7[%c2_25, %c0_26, %c0_27], %30 {strides = array<i32>} : memref<3x64x32xf32, #tpu.memory_space<vmem>>, vector<1x64x32xf32>,
    %c0_28 = arith.constant 0 : index
    %c0_29 = arith.constant 0 : index
    %c0_30 = arith.constant 0 : index
    %31 = vector.load %arg3[%c0_28, %c0_29, %c0_30] : memref<3x32x32xf32, #tpu.memory_space<vmem>>, vector<3x32x32xf32>
    %c0_31 = arith.constant 0 : index
    %c0_32 = arith.constant 0 : index
    %32 = vector.load %arg5[%c0_31, %c0_32] : memref<1x32xf32, #tpu.memory_space<vmem>>, vector<1x32xf32>
    %cst_33 = arith.constant 0.000000e+00 : f32
    %33 = vector.broadcast %cst_33 : f32 to vector<8x32xf32>
    %c0_i32 = arith.constant 0 : i32
    %c8_i32 = arith.constant 8 : i32
    %34 = arith.muli %c0_i32, %c8_i32 : i32
    %35 = tpu.assume_multiple %34, 8 : i32
    %c0_34 = arith.constant 0 : index
    %36 = arith.index_cast %35 : i32 to index
    %c0_35 = arith.constant 0 : index
    %37 = vector.load %arg7[%c0_34, %36, %c0_35] : memref<3x64x32xf32, #tpu.memory_space<vmem>>, vector<1x8x32xf32>
    %38 = vector.shape_cast %37 : vector<1x8x32xf32> to vector<8x32xf32>
    %c1_36 = arith.constant 1 : index
    %39 = arith.index_cast %35 : i32 to index
    %c0_37 = arith.constant 0 : index
    %40 = vector.load %arg7[%c1_36, %39, %c0_37] : memref<3x64x32xf32, #tpu.memory_space<vmem>>, vector<1x8x32xf32>
    %41 = vector.shape_cast %40 : vector<1x8x32xf32> to vector<8x32xf32>
    %c2_38 = arith.constant 2 : index
    %42 = arith.index_cast %35 : i32 to index
    %c0_39 = arith.constant 0 : index
    %43 = vector.load %arg7[%c2_38, %42, %c0_39] : memref<3x64x32xf32, #tpu.memory_space<vmem>>, vector<1x8x32xf32>
    %44 = vector.shape_cast %43 : vector<1x8x32xf32> to vector<8x32xf32>
    %45 = vector.extract_strided_slice %31 {offsets = [0, 0, 0], sizes = [1, 32, 32], strides = [1, 1, 1]} : vector<3x32x32xf32> to vector<1x32x32xf32>
    %46 = vector.shape_cast %45 : vector<1x32x32xf32> to vector<32x32xf32>
    %cst_40 = arith.constant dense<0.000000e+00> : vector<8x32xf32>
    %47 = tpu.matmul %33, %46, %cst_40 {dimension_numbers = #tpu.dot_dimension_numbers<[1], [0], [0], [1], [0, 0, 1, 1], [], []>} : vector<8x32xf32>, vector<32x32xf32>, vector<8x32xf32> -> vector<8x32xf32>
    %48 = vector.extract_strided_slice %31 {offsets = [1, 0, 0], sizes = [1, 32, 32], strides = [1, 1, 1]} : vector<3x32x32xf32> to vector<1x32x32xf32>
    %49 = vector.shape_cast %48 : vector<1x32x32xf32> to vector<32x32xf32>
    %cst_41 = arith.constant dense<0.000000e+00> : vector<8x32xf32>
    %50 = tpu.matmul %33, %49, %cst_41 {dimension_numbers = #tpu.dot_dimension_numbers<[1], [0], [0], [1], [0, 0, 1, 1], [], []>} : vector<8x32xf32>, vector<32x32xf32>, vector<8x32xf32> -> vector<8x32xf32>
    %51 = vector.extract_strided_slice %31 {offsets = [2, 0, 0], sizes = [1, 32, 32], strides = [1, 1, 1]} : vector<3x32x32xf32> to vector<1x32x32xf32>
    %52 = vector.shape_cast %51 : vector<1x32x32xf32> to vector<32x32xf32>
    %cst_42 = arith.constant dense<0.000000e+00> : vector<8x32xf32>
    %53 = tpu.matmul %33, %52, %cst_42 {dimension_numbers = #tpu.dot_dimension_numbers<[1], [0], [0], [1], [0, 0, 1, 1], [], []>} : vector<8x32xf32>, vector<32x32xf32>, vector<8x32xf32> -> vector<8x32xf32>
    %54 = arith.addf %38, %47 : vector<8x32xf32>
    %55 = arith.negf %54 : vector<8x32xf32>
    %56 = math.exp %55 : vector<8x32xf32>
    %cst_43 = arith.constant 1.000000e+00 : f32
    %57 = vector.broadcast %cst_43 : f32 to vector<8x32xf32>
    %58 = arith.addf %57, %56 : vector<8x32xf32>
    %59 = arith.divf %57, %58 : vector<8x32xf32>
    %60 = arith.addf %41, %50 : vector<8x32xf32>
    %61 = arith.negf %60 : vector<8x32xf32>
    %62 = math.exp %61 : vector<8x32xf32>
    %cst_44 = arith.constant 1.000000e+00 : f32
    %63 = vector.broadcast %cst_44 : f32 to vector<8x32xf32>
    %64 = arith.addf %63, %62 : vector<8x32xf32>
    %65 = arith.divf %63, %64 : vector<8x32xf32>
    %66 = vector.broadcast %32 : vector<1x32xf32> to vector<8x32xf32>
    %67 = arith.addf %53, %66 : vector<8x32xf32>
    %68 = arith.mulf %59, %67 : vector<8x32xf32>
    %69 = arith.addf %44, %68 : vector<8x32xf32>
    %70 = math.tanh %69 : vector<8x32xf32>
    %cst_45 = arith.constant 1.000000e+00 : f32
    %71 = vector.broadcast %cst_45 : f32 to vector<8x32xf32>
    %72 = arith.subf %71, %65 : vector<8x32xf32>
    %73 = arith.mulf %72, %70 : vector<8x32xf32>
    %74 = arith.mulf %65, %33 : vector<8x32xf32>
    %75 = arith.addf %73, %74 : vector<8x32xf32>
    %76 = arith.index_cast %c0_i32 : i32 to index
    %c0_46 = arith.constant 0 : index
    %c0_47 = arith.constant 0 : index
    %77 = vector.load %arg6[%76, %c0_46, %c0_47] : memref<8x8x32xf32, #tpu.memory_space<vmem>>, vector<1x8x32xf32>
    %78 = vector.shape_cast %77 : vector<1x8x32xf32> to vector<8x32xf32>
    %79 = vector.shape_cast %75 : vector<8x32xf32> to vector<1x8x32xf32>
    tpu.vector_store %arg6[%76, %c0_46, %c0_47], %79 {strides = array<i32>} : memref<8x8x32xf32, #tpu.memory_space<vmem>>, vector<1x8x32xf32>,
    %c1_i32 = arith.constant 1 : i32
    %c8_i32_48 = arith.constant 8 : i32
    %80 = arith.muli %c1_i32, %c8_i32_48 : i32
    %81 = tpu.assume_multiple %80, 8 : i32
    %c0_49 = arith.constant 0 : index
    %82 = arith.index_cast %81 : i32 to index
    %c0_50 = arith.constant 0 : index
    %83 = vector.load %arg7[%c0_49, %82, %c0_50] : memref<3x64x32xf32, #tpu.memory_space<vmem>>, vector<1x8x32xf32>
    %84 = vector.shape_cast %83 : vector<1x8x32xf32> to vector<8x32xf32>
    %c1_51 = arith.constant 1 : index
    %85 = arith.index_cast %81 : i32 to index
    %c0_52 = arith.constant 0 : index
    %86 = vector.load %arg7[%c1_51, %85, %c0_52] : memref<3x64x32xf32, #tpu.memory_space<vmem>>, vector<1x8x32xf32>
    %87 = vector.shape_cast %86 : vector<1x8x32xf32> to vector<8x32xf32>
    %c2_53 = arith.constant 2 : index
    %88 = arith.index_cast %81 : i32 to index
    %c0_54 = arith.constant 0 : index
    %89 = vector.load %arg7[%c2_53, %88, %c0_54] : memref<3x64x32xf32, #tpu.memory_space<vmem>>, vector<1x8x32xf32>
    %90 = vector.shape_cast %89 : vector<1x8x32xf32> to vector<8x32xf32>
    %91 = vector.extract_strided_slice %31 {offsets = [0, 0, 0], sizes = [1, 32, 32], strides = [1, 1, 1]} : vector<3x32x32xf32> to vector<1x32x32xf32>
    %92 = vector.shape_cast %91 : vector<1x32x32xf32> to vector<32x32xf32>
    %cst_55 = arith.constant dense<0.000000e+00> : vector<8x32xf32>
    %93 = tpu.matmul %75, %92, %cst_55 {dimension_numbers = #tpu.dot_dimension_numbers<[1], [0], [0], [1], [0, 0, 1, 1], [], []>} : vector<8x32xf32>, vector<32x32xf32>, vector<8x32xf32> -> vector<8x32xf32>
    %94 = vector.extract_strided_slice %31 {offsets = [1, 0, 0], sizes = [1, 32, 32], strides = [1, 1, 1]} : vector<3x32x32xf32> to vector<1x32x32xf32>
    %95 = vector.shape_cast %94 : vector<1x32x32xf32> to vector<32x32xf32>
    %cst_56 = arith.constant dense<0.000000e+00> : vector<8x32xf32>
    %96 = tpu.matmul %75, %95, %cst_56 {dimension_numbers = #tpu.dot_dimension_numbers<[1], [0], [0], [1], [0, 0, 1, 1], [], []>} : vector<8x32xf32>, vector<32x32xf32>, vector<8x32xf32> -> vector<8x32xf32>
    %97 = vector.extract_strided_slice %31 {offsets = [2, 0, 0], sizes = [1, 32, 32], strides = [1, 1, 1]} : vector<3x32x32xf32> to vector<1x32x32xf32>
    %98 = vector.shape_cast %97 : vector<1x32x32xf32> to vector<32x32xf32>
    %cst_57 = arith.constant dense<0.000000e+00> : vector<8x32xf32>
    %99 = tpu.matmul %75, %98, %cst_57 {dimension_numbers = #tpu.dot_dimension_numbers<[1], [0], [0], [1], [0, 0, 1, 1], [], []>} : vector<8x32xf32>, vector<32x32xf32>, vector<8x32xf32> -> vector<8x32xf32>
    %100 = arith.addf %84, %93 : vector<8x32xf32>
    %101 = arith.negf %100 : vector<8x32xf32>
    %102 = math.exp %101 : vector<8x32xf32>
    %cst_58 = arith.constant 1.000000e+00 : f32
    %103 = vector.broadcast %cst_58 : f32 to vector<8x32xf32>
    %104 = arith.addf %103, %102 : vector<8x32xf32>
    %105 = arith.divf %103, %104 : vector<8x32xf32>
    %106 = arith.addf %87, %96 : vector<8x32xf32>
    %107 = arith.negf %106 : vector<8x32xf32>
    %108 = math.exp %107 : vector<8x32xf32>
    %cst_59 = arith.constant 1.000000e+00 : f32
    %109 = vector.broadcast %cst_59 : f32 to vector<8x32xf32>
    %110 = arith.addf %109, %108 : vector<8x32xf32>
    %111 = arith.divf %109, %110 : vector<8x32xf32>
    %112 = vector.broadcast %32 : vector<1x32xf32> to vector<8x32xf32>
    %113 = arith.addf %99, %112 : vector<8x32xf32>
    %114 = arith.mulf %105, %113 : vector<8x32xf32>
    %115 = arith.addf %90, %114 : vector<8x32xf32>
    %116 = math.tanh %115 : vector<8x32xf32>
    %cst_60 = arith.constant 1.000000e+00 : f32
    %117 = vector.broadcast %cst_60 : f32 to vector<8x32xf32>
    %118 = arith.subf %117, %111 : vector<8x32xf32>
    %119 = arith.mulf %118, %116 : vector<8x32xf32>
    %120 = arith.mulf %111, %75 : vector<8x32xf32>
    %121 = arith.addf %119, %120 : vector<8x32xf32>
    %122 = arith.index_cast %c1_i32 : i32 to index
    %c0_61 = arith.constant 0 : index
    %c0_62 = arith.constant 0 : index
    %123 = vector.load %arg6[%122, %c0_61, %c0_62] : memref<8x8x32xf32, #tpu.memory_space<vmem>>, vector<1x8x32xf32>
    %124 = vector.shape_cast %123 : vector<1x8x32xf32> to vector<8x32xf32>
    %125 = vector.shape_cast %121 : vector<8x32xf32> to vector<1x8x32xf32>
    tpu.vector_store %arg6[%122, %c0_61, %c0_62], %125 {strides = array<i32>} : memref<8x8x32xf32, #tpu.memory_space<vmem>>, vector<1x8x32xf32>,
    %c2_i32 = arith.constant 2 : i32
    %c8_i32_63 = arith.constant 8 : i32
    %126 = arith.muli %c2_i32, %c8_i32_63 : i32
    %127 = tpu.assume_multiple %126, 8 : i32
    %c0_64 = arith.constant 0 : index
    %128 = arith.index_cast %127 : i32 to index
    %c0_65 = arith.constant 0 : index
    %129 = vector.load %arg7[%c0_64, %128, %c0_65] : memref<3x64x32xf32, #tpu.memory_space<vmem>>, vector<1x8x32xf32>
    %130 = vector.shape_cast %129 : vector<1x8x32xf32> to vector<8x32xf32>
    %c1_66 = arith.constant 1 : index
    %131 = arith.index_cast %127 : i32 to index
    %c0_67 = arith.constant 0 : index
    %132 = vector.load %arg7[%c1_66, %131, %c0_67] : memref<3x64x32xf32, #tpu.memory_space<vmem>>, vector<1x8x32xf32>
    %133 = vector.shape_cast %132 : vector<1x8x32xf32> to vector<8x32xf32>
    %c2_68 = arith.constant 2 : index
    %134 = arith.index_cast %127 : i32 to index
    %c0_69 = arith.constant 0 : index
    %135 = vector.load %arg7[%c2_68, %134, %c0_69] : memref<3x64x32xf32, #tpu.memory_space<vmem>>, vector<1x8x32xf32>
    %136 = vector.shape_cast %135 : vector<1x8x32xf32> to vector<8x32xf32>
    %137 = vector.extract_strided_slice %31 {offsets = [0, 0, 0], sizes = [1, 32, 32], strides = [1, 1, 1]} : vector<3x32x32xf32> to vector<1x32x32xf32>
    %138 = vector.shape_cast %137 : vector<1x32x32xf32> to vector<32x32xf32>
    %cst_70 = arith.constant dense<0.000000e+00> : vector<8x32xf32>
    %139 = tpu.matmul %121, %138, %cst_70 {dimension_numbers = #tpu.dot_dimension_numbers<[1], [0], [0], [1], [0, 0, 1, 1], [], []>} : vector<8x32xf32>, vector<32x32xf32>, vector<8x32xf32> -> vector<8x32xf32>
    %140 = vector.extract_strided_slice %31 {offsets = [1, 0, 0], sizes = [1, 32, 32], strides = [1, 1, 1]} : vector<3x32x32xf32> to vector<1x32x32xf32>
    %141 = vector.shape_cast %140 : vector<1x32x32xf32> to vector<32x32xf32>
    %cst_71 = arith.constant dense<0.000000e+00> : vector<8x32xf32>
    %142 = tpu.matmul %121, %141, %cst_71 {dimension_numbers = #tpu.dot_dimension_numbers<[1], [0], [0], [1], [0, 0, 1, 1], [], []>} : vector<8x32xf32>, vector<32x32xf32>, vector<8x32xf32> -> vector<8x32xf32>
    %143 = vector.extract_strided_slice %31 {offsets = [2, 0, 0], sizes = [1, 32, 32], strides = [1, 1, 1]} : vector<3x32x32xf32> to vector<1x32x32xf32>
    %144 = vector.shape_cast %143 : vector<1x32x32xf32> to vector<32x32xf32>
    %cst_72 = arith.constant dense<0.000000e+00> : vector<8x32xf32>
    %145 = tpu.matmul %121, %144, %cst_72 {dimension_numbers = #tpu.dot_dimension_numbers<[1], [0], [0], [1], [0, 0, 1, 1], [], []>} : vector<8x32xf32>, vector<32x32xf32>, vector<8x32xf32> -> vector<8x32xf32>
    %146 = arith.addf %130, %139 : vector<8x32xf32>
    %147 = arith.negf %146 : vector<8x32xf32>
    %148 = math.exp %147 : vector<8x32xf32>
    %cst_73 = arith.constant 1.000000e+00 : f32
    %149 = vector.broadcast %cst_73 : f32 to vector<8x32xf32>
    %150 = arith.addf %149, %148 : vector<8x32xf32>
    %151 = arith.divf %149, %150 : vector<8x32xf32>
    %152 = arith.addf %133, %142 : vector<8x32xf32>
    %153 = arith.negf %152 : vector<8x32xf32>
    %154 = math.exp %153 : vector<8x32xf32>
    %cst_74 = arith.constant 1.000000e+00 : f32
    %155 = vector.broadcast %cst_74 : f32 to vector<8x32xf32>
    %156 = arith.addf %155, %154 : vector<8x32xf32>
    %157 = arith.divf %155, %156 : vector<8x32xf32>
    %158 = vector.broadcast %32 : vector<1x32xf32> to vector<8x32xf32>
    %159 = arith.addf %145, %158 : vector<8x32xf32>
    %160 = arith.mulf %151, %159 : vector<8x32xf32>
    %161 = arith.addf %136, %160 : vector<8x32xf32>
    %162 = math.tanh %161 : vector<8x32xf32>
    %cst_75 = arith.constant 1.000000e+00 : f32
    %163 = vector.broadcast %cst_75 : f32 to vector<8x32xf32>
    %164 = arith.subf %163, %157 : vector<8x32xf32>
    %165 = arith.mulf %164, %162 : vector<8x32xf32>
    %166 = arith.mulf %157, %121 : vector<8x32xf32>
    %167 = arith.addf %165, %166 : vector<8x32xf32>
    %168 = arith.index_cast %c2_i32 : i32 to index
    %c0_76 = arith.constant 0 : index
    %c0_77 = arith.constant 0 : index
    %169 = vector.load %arg6[%168, %c0_76, %c0_77] : memref<8x8x32xf32, #tpu.memory_space<vmem>>, vector<1x8x32xf32>
    %170 = vector.shape_cast %169 : vector<1x8x32xf32> to vector<8x32xf32>
    %171 = vector.shape_cast %167 : vector<8x32xf32> to vector<1x8x32xf32>
    tpu.vector_store %arg6[%168, %c0_76, %c0_77], %171 {strides = array<i32>} : memref<8x8x32xf32, #tpu.memory_space<vmem>>, vector<1x8x32xf32>,
    %c3_i32 = arith.constant 3 : i32
    %c8_i32_78 = arith.constant 8 : i32
    %172 = arith.muli %c3_i32, %c8_i32_78 : i32
    %173 = tpu.assume_multiple %172, 8 : i32
    %c0_79 = arith.constant 0 : index
    %174 = arith.index_cast %173 : i32 to index
    %c0_80 = arith.constant 0 : index
    %175 = vector.load %arg7[%c0_79, %174, %c0_80] : memref<3x64x32xf32, #tpu.memory_space<vmem>>, vector<1x8x32xf32>
    %176 = vector.shape_cast %175 : vector<1x8x32xf32> to vector<8x32xf32>
    %c1_81 = arith.constant 1 : index
    %177 = arith.index_cast %173 : i32 to index
    %c0_82 = arith.constant 0 : index
    %178 = vector.load %arg7[%c1_81, %177, %c0_82] : memref<3x64x32xf32, #tpu.memory_space<vmem>>, vector<1x8x32xf32>
    %179 = vector.shape_cast %178 : vector<1x8x32xf32> to vector<8x32xf32>
    %c2_83 = arith.constant 2 : index
    %180 = arith.index_cast %173 : i32 to index
    %c0_84 = arith.constant 0 : index
    %181 = vector.load %arg7[%c2_83, %180, %c0_84] : memref<3x64x32xf32, #tpu.memory_space<vmem>>, vector<1x8x32xf32>
    %182 = vector.shape_cast %181 : vector<1x8x32xf32> to vector<8x32xf32>
    %183 = vector.extract_strided_slice %31 {offsets = [0, 0, 0], sizes = [1, 32, 32], strides = [1, 1, 1]} : vector<3x32x32xf32> to vector<1x32x32xf32>
    %184 = vector.shape_cast %183 : vector<1x32x32xf32> to vector<32x32xf32>
    %cst_85 = arith.constant dense<0.000000e+00> : vector<8x32xf32>
    %185 = tpu.matmul %167, %184, %cst_85 {dimension_numbers = #tpu.dot_dimension_numbers<[1], [0], [0], [1], [0, 0, 1, 1], [], []>} : vector<8x32xf32>, vector<32x32xf32>, vector<8x32xf32> -> vector<8x32xf32>
    %186 = vector.extract_strided_slice %31 {offsets = [1, 0, 0], sizes = [1, 32, 32], strides = [1, 1, 1]} : vector<3x32x32xf32> to vector<1x32x32xf32>
    %187 = vector.shape_cast %186 : vector<1x32x32xf32> to vector<32x32xf32>
    %cst_86 = arith.constant dense<0.000000e+00> : vector<8x32xf32>
    %188 = tpu.matmul %167, %187, %cst_86 {dimension_numbers = #tpu.dot_dimension_numbers<[1], [0], [0], [1], [0, 0, 1, 1], [], []>} : vector<8x32xf32>, vector<32x32xf32>, vector<8x32xf32> -> vector<8x32xf32>
    %189 = vector.extract_strided_slice %31 {offsets = [2, 0, 0], sizes = [1, 32, 32], strides = [1, 1, 1]} : vector<3x32x32xf32> to vector<1x32x32xf32>
    %190 = vector.shape_cast %189 : vector<1x32x32xf32> to vector<32x32xf32>
    %cst_87 = arith.constant dense<0.000000e+00> : vector<8x32xf32>
    %191 = tpu.matmul %167, %190, %cst_87 {dimension_numbers = #tpu.dot_dimension_numbers<[1], [0], [0], [1], [0, 0, 1, 1], [], []>} : vector<8x32xf32>, vector<32x32xf32>, vector<8x32xf32> -> vector<8x32xf32>
    %192 = arith.addf %176, %185 : vector<8x32xf32>
    %193 = arith.negf %192 : vector<8x32xf32>
    %194 = math.exp %193 : vector<8x32xf32>
    %cst_88 = arith.constant 1.000000e+00 : f32
    %195 = vector.broadcast %cst_88 : f32 to vector<8x32xf32>
    %196 = arith.addf %195, %194 : vector<8x32xf32>
    %197 = arith.divf %195, %196 : vector<8x32xf32>
    %198 = arith.addf %179, %188 : vector<8x32xf32>
    %199 = arith.negf %198 : vector<8x32xf32>
    %200 = math.exp %199 : vector<8x32xf32>
    %cst_89 = arith.constant 1.000000e+00 : f32
    %201 = vector.broadcast %cst_89 : f32 to vector<8x32xf32>
    %202 = arith.addf %201, %200 : vector<8x32xf32>
    %203 = arith.divf %201, %202 : vector<8x32xf32>
    %204 = vector.broadcast %32 : vector<1x32xf32> to vector<8x32xf32>
    %205 = arith.addf %191, %204 : vector<8x32xf32>
    %206 = arith.mulf %197, %205 : vector<8x32xf32>
    %207 = arith.addf %182, %206 : vector<8x32xf32>
    %208 = math.tanh %207 : vector<8x32xf32>
    %cst_90 = arith.constant 1.000000e+00 : f32
    %209 = vector.broadcast %cst_90 : f32 to vector<8x32xf32>
    %210 = arith.subf %209, %203 : vector<8x32xf32>
    %211 = arith.mulf %210, %208 : vector<8x32xf32>
    %212 = arith.mulf %203, %167 : vector<8x32xf32>
    %213 = arith.addf %211, %212 : vector<8x32xf32>
    %214 = arith.index_cast %c3_i32 : i32 to index
    %c0_91 = arith.constant 0 : index
    %c0_92 = arith.constant 0 : index
    %215 = vector.load %arg6[%214, %c0_91, %c0_92] : memref<8x8x32xf32, #tpu.memory_space<vmem>>, vector<1x8x32xf32>
    %216 = vector.shape_cast %215 : vector<1x8x32xf32> to vector<8x32xf32>
    %217 = vector.shape_cast %213 : vector<8x32xf32> to vector<1x8x32xf32>
    tpu.vector_store %arg6[%214, %c0_91, %c0_92], %217 {strides = array<i32>} : memref<8x8x32xf32, #tpu.memory_space<vmem>>, vector<1x8x32xf32>,
    %c4_i32 = arith.constant 4 : i32
    %c8_i32_93 = arith.constant 8 : i32
    %218 = arith.muli %c4_i32, %c8_i32_93 : i32
    %219 = tpu.assume_multiple %218, 8 : i32
    %c0_94 = arith.constant 0 : index
    %220 = arith.index_cast %219 : i32 to index
    %c0_95 = arith.constant 0 : index
    %221 = vector.load %arg7[%c0_94, %220, %c0_95] : memref<3x64x32xf32, #tpu.memory_space<vmem>>, vector<1x8x32xf32>
    %222 = vector.shape_cast %221 : vector<1x8x32xf32> to vector<8x32xf32>
    %c1_96 = arith.constant 1 : index
    %223 = arith.index_cast %219 : i32 to index
    %c0_97 = arith.constant 0 : index
    %224 = vector.load %arg7[%c1_96, %223, %c0_97] : memref<3x64x32xf32, #tpu.memory_space<vmem>>, vector<1x8x32xf32>
    %225 = vector.shape_cast %224 : vector<1x8x32xf32> to vector<8x32xf32>
    %c2_98 = arith.constant 2 : index
    %226 = arith.index_cast %219 : i32 to index
    %c0_99 = arith.constant 0 : index
    %227 = vector.load %arg7[%c2_98, %226, %c0_99] : memref<3x64x32xf32, #tpu.memory_space<vmem>>, vector<1x8x32xf32>
    %228 = vector.shape_cast %227 : vector<1x8x32xf32> to vector<8x32xf32>
    %229 = vector.extract_strided_slice %31 {offsets = [0, 0, 0], sizes = [1, 32, 32], strides = [1, 1, 1]} : vector<3x32x32xf32> to vector<1x32x32xf32>
    %230 = vector.shape_cast %229 : vector<1x32x32xf32> to vector<32x32xf32>
    %cst_100 = arith.constant dense<0.000000e+00> : vector<8x32xf32>
    %231 = tpu.matmul %213, %230, %cst_100 {dimension_numbers = #tpu.dot_dimension_numbers<[1], [0], [0], [1], [0, 0, 1, 1], [], []>} : vector<8x32xf32>, vector<32x32xf32>, vector<8x32xf32> -> vector<8x32xf32>
    %232 = vector.extract_strided_slice %31 {offsets = [1, 0, 0], sizes = [1, 32, 32], strides = [1, 1, 1]} : vector<3x32x32xf32> to vector<1x32x32xf32>
    %233 = vector.shape_cast %232 : vector<1x32x32xf32> to vector<32x32xf32>
    %cst_101 = arith.constant dense<0.000000e+00> : vector<8x32xf32>
    %234 = tpu.matmul %213, %233, %cst_101 {dimension_numbers = #tpu.dot_dimension_numbers<[1], [0], [0], [1], [0, 0, 1, 1], [], []>} : vector<8x32xf32>, vector<32x32xf32>, vector<8x32xf32> -> vector<8x32xf32>
    %235 = vector.extract_strided_slice %31 {offsets = [2, 0, 0], sizes = [1, 32, 32], strides = [1, 1, 1]} : vector<3x32x32xf32> to vector<1x32x32xf32>
    %236 = vector.shape_cast %235 : vector<1x32x32xf32> to vector<32x32xf32>
    %cst_102 = arith.constant dense<0.000000e+00> : vector<8x32xf32>
    %237 = tpu.matmul %213, %236, %cst_102 {dimension_numbers = #tpu.dot_dimension_numbers<[1], [0], [0], [1], [0, 0, 1, 1], [], []>} : vector<8x32xf32>, vector<32x32xf32>, vector<8x32xf32> -> vector<8x32xf32>
    %238 = arith.addf %222, %231 : vector<8x32xf32>
    %239 = arith.negf %238 : vector<8x32xf32>
    %240 = math.exp %239 : vector<8x32xf32>
    %cst_103 = arith.constant 1.000000e+00 : f32
    %241 = vector.broadcast %cst_103 : f32 to vector<8x32xf32>
    %242 = arith.addf %241, %240 : vector<8x32xf32>
    %243 = arith.divf %241, %242 : vector<8x32xf32>
    %244 = arith.addf %225, %234 : vector<8x32xf32>
    %245 = arith.negf %244 : vector<8x32xf32>
    %246 = math.exp %245 : vector<8x32xf32>
    %cst_104 = arith.constant 1.000000e+00 : f32
    %247 = vector.broadcast %cst_104 : f32 to vector<8x32xf32>
    %248 = arith.addf %247, %246 : vector<8x32xf32>
    %249 = arith.divf %247, %248 : vector<8x32xf32>
    %250 = vector.broadcast %32 : vector<1x32xf32> to vector<8x32xf32>
    %251 = arith.addf %237, %250 : vector<8x32xf32>
    %252 = arith.mulf %243, %251 : vector<8x32xf32>
    %253 = arith.addf %228, %252 : vector<8x32xf32>
    %254 = math.tanh %253 : vector<8x32xf32>
    %cst_105 = arith.constant 1.000000e+00 : f32
    %255 = vector.broadcast %cst_105 : f32 to vector<8x32xf32>
    %256 = arith.subf %255, %249 : vector<8x32xf32>
    %257 = arith.mulf %256, %254 : vector<8x32xf32>
    %258 = arith.mulf %249, %213 : vector<8x32xf32>
    %259 = arith.addf %257, %258 : vector<8x32xf32>
    %260 = arith.index_cast %c4_i32 : i32 to index
    %c0_106 = arith.constant 0 : index
    %c0_107 = arith.constant 0 : index
    %261 = vector.load %arg6[%260, %c0_106, %c0_107] : memref<8x8x32xf32, #tpu.memory_space<vmem>>, vector<1x8x32xf32>
    %262 = vector.shape_cast %261 : vector<1x8x32xf32> to vector<8x32xf32>
    %263 = vector.shape_cast %259 : vector<8x32xf32> to vector<1x8x32xf32>
    tpu.vector_store %arg6[%260, %c0_106, %c0_107], %263 {strides = array<i32>} : memref<8x8x32xf32, #tpu.memory_space<vmem>>, vector<1x8x32xf32>,
    %c5_i32 = arith.constant 5 : i32
    %c8_i32_108 = arith.constant 8 : i32
    %264 = arith.muli %c5_i32, %c8_i32_108 : i32
    %265 = tpu.assume_multiple %264, 8 : i32
    %c0_109 = arith.constant 0 : index
    %266 = arith.index_cast %265 : i32 to index
    %c0_110 = arith.constant 0 : index
    %267 = vector.load %arg7[%c0_109, %266, %c0_110] : memref<3x64x32xf32, #tpu.memory_space<vmem>>, vector<1x8x32xf32>
    %268 = vector.shape_cast %267 : vector<1x8x32xf32> to vector<8x32xf32>
    %c1_111 = arith.constant 1 : index
    %269 = arith.index_cast %265 : i32 to index
    %c0_112 = arith.constant 0 : index
    %270 = vector.load %arg7[%c1_111, %269, %c0_112] : memref<3x64x32xf32, #tpu.memory_space<vmem>>, vector<1x8x32xf32>
    %271 = vector.shape_cast %270 : vector<1x8x32xf32> to vector<8x32xf32>
    %c2_113 = arith.constant 2 : index
    %272 = arith.index_cast %265 : i32 to index
    %c0_114 = arith.constant 0 : index
    %273 = vector.load %arg7[%c2_113, %272, %c0_114] : memref<3x64x32xf32, #tpu.memory_space<vmem>>, vector<1x8x32xf32>
    %274 = vector.shape_cast %273 : vector<1x8x32xf32> to vector<8x32xf32>
    %275 = vector.extract_strided_slice %31 {offsets = [0, 0, 0], sizes = [1, 32, 32], strides = [1, 1, 1]} : vector<3x32x32xf32> to vector<1x32x32xf32>
    %276 = vector.shape_cast %275 : vector<1x32x32xf32> to vector<32x32xf32>
    %cst_115 = arith.constant dense<0.000000e+00> : vector<8x32xf32>
    %277 = tpu.matmul %259, %276, %cst_115 {dimension_numbers = #tpu.dot_dimension_numbers<[1], [0], [0], [1], [0, 0, 1, 1], [], []>} : vector<8x32xf32>, vector<32x32xf32>, vector<8x32xf32> -> vector<8x32xf32>
    %278 = vector.extract_strided_slice %31 {offsets = [1, 0, 0], sizes = [1, 32, 32], strides = [1, 1, 1]} : vector<3x32x32xf32> to vector<1x32x32xf32>
    %279 = vector.shape_cast %278 : vector<1x32x32xf32> to vector<32x32xf32>
    %cst_116 = arith.constant dense<0.000000e+00> : vector<8x32xf32>
    %280 = tpu.matmul %259, %279, %cst_116 {dimension_numbers = #tpu.dot_dimension_numbers<[1], [0], [0], [1], [0, 0, 1, 1], [], []>} : vector<8x32xf32>, vector<32x32xf32>, vector<8x32xf32> -> vector<8x32xf32>
    %281 = vector.extract_strided_slice %31 {offsets = [2, 0, 0], sizes = [1, 32, 32], strides = [1, 1, 1]} : vector<3x32x32xf32> to vector<1x32x32xf32>
    %282 = vector.shape_cast %281 : vector<1x32x32xf32> to vector<32x32xf32>
    %cst_117 = arith.constant dense<0.000000e+00> : vector<8x32xf32>
    %283 = tpu.matmul %259, %282, %cst_117 {dimension_numbers = #tpu.dot_dimension_numbers<[1], [0], [0], [1], [0, 0, 1, 1], [], []>} : vector<8x32xf32>, vector<32x32xf32>, vector<8x32xf32> -> vector<8x32xf32>
    %284 = arith.addf %268, %277 : vector<8x32xf32>
    %285 = arith.negf %284 : vector<8x32xf32>
    %286 = math.exp %285 : vector<8x32xf32>
    %cst_118 = arith.constant 1.000000e+00 : f32
    %287 = vector.broadcast %cst_118 : f32 to vector<8x32xf32>
    %288 = arith.addf %287, %286 : vector<8x32xf32>
    %289 = arith.divf %287, %288 : vector<8x32xf32>
    %290 = arith.addf %271, %280 : vector<8x32xf32>
    %291 = arith.negf %290 : vector<8x32xf32>
    %292 = math.exp %291 : vector<8x32xf32>
    %cst_119 = arith.constant 1.000000e+00 : f32
    %293 = vector.broadcast %cst_119 : f32 to vector<8x32xf32>
    %294 = arith.addf %293, %292 : vector<8x32xf32>
    %295 = arith.divf %293, %294 : vector<8x32xf32>
    %296 = vector.broadcast %32 : vector<1x32xf32> to vector<8x32xf32>
    %297 = arith.addf %283, %296 : vector<8x32xf32>
    %298 = arith.mulf %289, %297 : vector<8x32xf32>
    %299 = arith.addf %274, %298 : vector<8x32xf32>
    %300 = math.tanh %299 : vector<8x32xf32>
    %cst_120 = arith.constant 1.000000e+00 : f32
    %301 = vector.broadcast %cst_120 : f32 to vector<8x32xf32>
    %302 = arith.subf %301, %295 : vector<8x32xf32>
    %303 = arith.mulf %302, %300 : vector<8x32xf32>
    %304 = arith.mulf %295, %259 : vector<8x32xf32>
    %305 = arith.addf %303, %304 : vector<8x32xf32>
    %306 = arith.index_cast %c5_i32 : i32 to index
    %c0_121 = arith.constant 0 : index
    %c0_122 = arith.constant 0 : index
    %307 = vector.load %arg6[%306, %c0_121, %c0_122] : memref<8x8x32xf32, #tpu.memory_space<vmem>>, vector<1x8x32xf32>
    %308 = vector.shape_cast %307 : vector<1x8x32xf32> to vector<8x32xf32>
    %309 = vector.shape_cast %305 : vector<8x32xf32> to vector<1x8x32xf32>
    tpu.vector_store %arg6[%306, %c0_121, %c0_122], %309 {strides = array<i32>} : memref<8x8x32xf32, #tpu.memory_space<vmem>>, vector<1x8x32xf32>,
    %c6_i32 = arith.constant 6 : i32
    %c8_i32_123 = arith.constant 8 : i32
    %310 = arith.muli %c6_i32, %c8_i32_123 : i32
    %311 = tpu.assume_multiple %310, 8 : i32
    %c0_124 = arith.constant 0 : index
    %312 = arith.index_cast %311 : i32 to index
    %c0_125 = arith.constant 0 : index
    %313 = vector.load %arg7[%c0_124, %312, %c0_125] : memref<3x64x32xf32, #tpu.memory_space<vmem>>, vector<1x8x32xf32>
    %314 = vector.shape_cast %313 : vector<1x8x32xf32> to vector<8x32xf32>
    %c1_126 = arith.constant 1 : index
    %315 = arith.index_cast %311 : i32 to index
    %c0_127 = arith.constant 0 : index
    %316 = vector.load %arg7[%c1_126, %315, %c0_127] : memref<3x64x32xf32, #tpu.memory_space<vmem>>, vector<1x8x32xf32>
    %317 = vector.shape_cast %316 : vector<1x8x32xf32> to vector<8x32xf32>
    %c2_128 = arith.constant 2 : index
    %318 = arith.index_cast %311 : i32 to index
    %c0_129 = arith.constant 0 : index
    %319 = vector.load %arg7[%c2_128, %318, %c0_129] : memref<3x64x32xf32, #tpu.memory_space<vmem>>, vector<1x8x32xf32>
    %320 = vector.shape_cast %319 : vector<1x8x32xf32> to vector<8x32xf32>
    %321 = vector.extract_strided_slice %31 {offsets = [0, 0, 0], sizes = [1, 32, 32], strides = [1, 1, 1]} : vector<3x32x32xf32> to vector<1x32x32xf32>
    %322 = vector.shape_cast %321 : vector<1x32x32xf32> to vector<32x32xf32>
    %cst_130 = arith.constant dense<0.000000e+00> : vector<8x32xf32>
    %323 = tpu.matmul %305, %322, %cst_130 {dimension_numbers = #tpu.dot_dimension_numbers<[1], [0], [0], [1], [0, 0, 1, 1], [], []>} : vector<8x32xf32>, vector<32x32xf32>, vector<8x32xf32> -> vector<8x32xf32>
    %324 = vector.extract_strided_slice %31 {offsets = [1, 0, 0], sizes = [1, 32, 32], strides = [1, 1, 1]} : vector<3x32x32xf32> to vector<1x32x32xf32>
    %325 = vector.shape_cast %324 : vector<1x32x32xf32> to vector<32x32xf32>
    %cst_131 = arith.constant dense<0.000000e+00> : vector<8x32xf32>
    %326 = tpu.matmul %305, %325, %cst_131 {dimension_numbers = #tpu.dot_dimension_numbers<[1], [0], [0], [1], [0, 0, 1, 1], [], []>} : vector<8x32xf32>, vector<32x32xf32>, vector<8x32xf32> -> vector<8x32xf32>
    %327 = vector.extract_strided_slice %31 {offsets = [2, 0, 0], sizes = [1, 32, 32], strides = [1, 1, 1]} : vector<3x32x32xf32> to vector<1x32x32xf32>
    %328 = vector.shape_cast %327 : vector<1x32x32xf32> to vector<32x32xf32>
    %cst_132 = arith.constant dense<0.000000e+00> : vector<8x32xf32>
    %329 = tpu.matmul %305, %328, %cst_132 {dimension_numbers = #tpu.dot_dimension_numbers<[1], [0], [0], [1], [0, 0, 1, 1], [], []>} : vector<8x32xf32>, vector<32x32xf32>, vector<8x32xf32> -> vector<8x32xf32>
    %330 = arith.addf %314, %323 : vector<8x32xf32>
    %331 = arith.negf %330 : vector<8x32xf32>
    %332 = math.exp %331 : vector<8x32xf32>
    %cst_133 = arith.constant 1.000000e+00 : f32
    %333 = vector.broadcast %cst_133 : f32 to vector<8x32xf32>
    %334 = arith.addf %333, %332 : vector<8x32xf32>
    %335 = arith.divf %333, %334 : vector<8x32xf32>
    %336 = arith.addf %317, %326 : vector<8x32xf32>
    %337 = arith.negf %336 : vector<8x32xf32>
    %338 = math.exp %337 : vector<8x32xf32>
    %cst_134 = arith.constant 1.000000e+00 : f32
    %339 = vector.broadcast %cst_134 : f32 to vector<8x32xf32>
    %340 = arith.addf %339, %338 : vector<8x32xf32>
    %341 = arith.divf %339, %340 : vector<8x32xf32>
    %342 = vector.broadcast %32 : vector<1x32xf32> to vector<8x32xf32>
    %343 = arith.addf %329, %342 : vector<8x32xf32>
    %344 = arith.mulf %335, %343 : vector<8x32xf32>
    %345 = arith.addf %320, %344 : vector<8x32xf32>
    %346 = math.tanh %345 : vector<8x32xf32>
    %cst_135 = arith.constant 1.000000e+00 : f32
    %347 = vector.broadcast %cst_135 : f32 to vector<8x32xf32>
    %348 = arith.subf %347, %341 : vector<8x32xf32>
    %349 = arith.mulf %348, %346 : vector<8x32xf32>
    %350 = arith.mulf %341, %305 : vector<8x32xf32>
    %351 = arith.addf %349, %350 : vector<8x32xf32>
    %352 = arith.index_cast %c6_i32 : i32 to index
    %c0_136 = arith.constant 0 : index
    %c0_137 = arith.constant 0 : index
    %353 = vector.load %arg6[%352, %c0_136, %c0_137] : memref<8x8x32xf32, #tpu.memory_space<vmem>>, vector<1x8x32xf32>
    %354 = vector.shape_cast %353 : vector<1x8x32xf32> to vector<8x32xf32>
    %355 = vector.shape_cast %351 : vector<8x32xf32> to vector<1x8x32xf32>
    tpu.vector_store %arg6[%352, %c0_136, %c0_137], %355 {strides = array<i32>} : memref<8x8x32xf32, #tpu.memory_space<vmem>>, vector<1x8x32xf32>,
    %c7_i32 = arith.constant 7 : i32
    %c8_i32_138 = arith.constant 8 : i32
    %356 = arith.muli %c7_i32, %c8_i32_138 : i32
    %357 = tpu.assume_multiple %356, 8 : i32
    %c0_139 = arith.constant 0 : index
    %358 = arith.index_cast %357 : i32 to index
    %c0_140 = arith.constant 0 : index
    %359 = vector.load %arg7[%c0_139, %358, %c0_140] : memref<3x64x32xf32, #tpu.memory_space<vmem>>, vector<1x8x32xf32>
    %360 = vector.shape_cast %359 : vector<1x8x32xf32> to vector<8x32xf32>
    %c1_141 = arith.constant 1 : index
    %361 = arith.index_cast %357 : i32 to index
    %c0_142 = arith.constant 0 : index
    %362 = vector.load %arg7[%c1_141, %361, %c0_142] : memref<3x64x32xf32, #tpu.memory_space<vmem>>, vector<1x8x32xf32>
    %363 = vector.shape_cast %362 : vector<1x8x32xf32> to vector<8x32xf32>
    %c2_143 = arith.constant 2 : index
    %364 = arith.index_cast %357 : i32 to index
    %c0_144 = arith.constant 0 : index
    %365 = vector.load %arg7[%c2_143, %364, %c0_144] : memref<3x64x32xf32, #tpu.memory_space<vmem>>, vector<1x8x32xf32>
    %366 = vector.shape_cast %365 : vector<1x8x32xf32> to vector<8x32xf32>
    %367 = vector.extract_strided_slice %31 {offsets = [0, 0, 0], sizes = [1, 32, 32], strides = [1, 1, 1]} : vector<3x32x32xf32> to vector<1x32x32xf32>
    %368 = vector.shape_cast %367 : vector<1x32x32xf32> to vector<32x32xf32>
    %cst_145 = arith.constant dense<0.000000e+00> : vector<8x32xf32>
    %369 = tpu.matmul %351, %368, %cst_145 {dimension_numbers = #tpu.dot_dimension_numbers<[1], [0], [0], [1], [0, 0, 1, 1], [], []>} : vector<8x32xf32>, vector<32x32xf32>, vector<8x32xf32> -> vector<8x32xf32>
    %370 = vector.extract_strided_slice %31 {offsets = [1, 0, 0], sizes = [1, 32, 32], strides = [1, 1, 1]} : vector<3x32x32xf32> to vector<1x32x32xf32>
    %371 = vector.shape_cast %370 : vector<1x32x32xf32> to vector<32x32xf32>
    %cst_146 = arith.constant dense<0.000000e+00> : vector<8x32xf32>
    %372 = tpu.matmul %351, %371, %cst_146 {dimension_numbers = #tpu.dot_dimension_numbers<[1], [0], [0], [1], [0, 0, 1, 1], [], []>} : vector<8x32xf32>, vector<32x32xf32>, vector<8x32xf32> -> vector<8x32xf32>
    %373 = vector.extract_strided_slice %31 {offsets = [2, 0, 0], sizes = [1, 32, 32], strides = [1, 1, 1]} : vector<3x32x32xf32> to vector<1x32x32xf32>
    %374 = vector.shape_cast %373 : vector<1x32x32xf32> to vector<32x32xf32>
    %cst_147 = arith.constant dense<0.000000e+00> : vector<8x32xf32>
    %375 = tpu.matmul %351, %374, %cst_147 {dimension_numbers = #tpu.dot_dimension_numbers<[1], [0], [0], [1], [0, 0, 1, 1], [], []>} : vector<8x32xf32>, vector<32x32xf32>, vector<8x32xf32> -> vector<8x32xf32>
    %376 = arith.addf %360, %369 : vector<8x32xf32>
    %377 = arith.negf %376 : vector<8x32xf32>
    %378 = math.exp %377 : vector<8x32xf32>
    %cst_148 = arith.constant 1.000000e+00 : f32
    %379 = vector.broadcast %cst_148 : f32 to vector<8x32xf32>
    %380 = arith.addf %379, %378 : vector<8x32xf32>
    %381 = arith.divf %379, %380 : vector<8x32xf32>
    %382 = arith.addf %363, %372 : vector<8x32xf32>
    %383 = arith.negf %382 : vector<8x32xf32>
    %384 = math.exp %383 : vector<8x32xf32>
    %cst_149 = arith.constant 1.000000e+00 : f32
    %385 = vector.broadcast %cst_149 : f32 to vector<8x32xf32>
    %386 = arith.addf %385, %384 : vector<8x32xf32>
    %387 = arith.divf %385, %386 : vector<8x32xf32>
    %388 = vector.broadcast %32 : vector<1x32xf32> to vector<8x32xf32>
    %389 = arith.addf %375, %388 : vector<8x32xf32>
    %390 = arith.mulf %381, %389 : vector<8x32xf32>
    %391 = arith.addf %366, %390 : vector<8x32xf32>
    %392 = math.tanh %391 : vector<8x32xf32>
    %cst_150 = arith.constant 1.000000e+00 : f32
    %393 = vector.broadcast %cst_150 : f32 to vector<8x32xf32>
    %394 = arith.subf %393, %387 : vector<8x32xf32>
    %395 = arith.mulf %394, %392 : vector<8x32xf32>
    %396 = arith.mulf %387, %351 : vector<8x32xf32>
    %397 = arith.addf %395, %396 : vector<8x32xf32>
    %398 = arith.index_cast %c7_i32 : i32 to index
    %c0_151 = arith.constant 0 : index
    %c0_152 = arith.constant 0 : index
    %399 = vector.load %arg6[%398, %c0_151, %c0_152] : memref<8x8x32xf32, #tpu.memory_space<vmem>>, vector<1x8x32xf32>
    %400 = vector.shape_cast %399 : vector<1x8x32xf32> to vector<8x32xf32>
    %401 = vector.shape_cast %397 : vector<8x32xf32> to vector<1x8x32xf32>
    tpu.vector_store %arg6[%398, %c0_151, %c0_152], %401 {strides = array<i32>} : memref<8x8x32xf32, #tpu.memory_space<vmem>>, vector<1x8x32xf32>,
    %c8_i32_153 = arith.constant 8 : i32
    return
  }
  func.func @transform_0(%arg0: i32) -> (i32, i32) {
    %c0_i32 = arith.constant 0 : i32
    %c0_i32_0 = arith.constant 0 : i32
    %c0_i32_1 = arith.constant 0 : i32
    return %c0_i32, %c0_i32_0 : i32, i32
  }
  func.func @transform_1(%arg0: i32) -> (i32, i32, i32) {
    %c0_i32 = arith.constant 0 : i32
    %c0_i32_0 = arith.constant 0 : i32
    %c0_i32_1 = arith.constant 0 : i32
    %c0_i32_2 = arith.constant 0 : i32
    return %c0_i32, %c0_i32_0, %c0_i32_1 : i32, i32, i32
  }
  func.func @transform_2(%arg0: i32) -> (i32, i32, i32) {
    %c0_i32 = arith.constant 0 : i32
    %c0_i32_0 = arith.constant 0 : i32
    %c0_i32_1 = arith.constant 0 : i32
    %c0_i32_2 = arith.constant 0 : i32
    return %c0_i32, %c0_i32_0, %c0_i32_1 : i32, i32, i32
  }
  func.func @transform_3(%arg0: i32) -> (i32, i32, i32) {
    %c0_i32 = arith.constant 0 : i32
    %c0_i32_0 = arith.constant 0 : i32
    %c0_i32_1 = arith.constant 0 : i32
    %c0_i32_2 = arith.constant 0 : i32
    return %c0_i32, %c0_i32_0, %c0_i32_1 : i32, i32, i32
  }
  func.func @transform_4(%arg0: i32) -> (i32, i32) {
    %c0_i32 = arith.constant 0 : i32
    %c0_i32_0 = arith.constant 0 : i32
    %c0_i32_1 = arith.constant 0 : i32
    return %c0_i32, %c0_i32_0 : i32, i32
  }
  func.func @transform_5(%arg0: i32) -> (i32, i32, i32) {
    %c0_i32 = arith.constant 0 : i32
    %c0_i32_0 = arith.constant 0 : i32
    %c0_i32_1 = arith.constant 0 : i32
    %c0_i32_2 = arith.constant 0 : i32
    return %c0_i32, %c0_i32_0, %c0_i32_1 : i32, i32, i32
  }
}

</mosaic_0001>

<bundles_post_ra>
// kernel: rnn_forward.1
= control target key start
LH: loop header
LB: loop body
LE: loop exit
PB: predicated region body
PF: predicated region fallthrough
CT: control target
= control target key end

     0   :  { %vm35_vm0 = vcmask 130048   ;;  %v1416_v13 = vmov 0.0   ;;  %s1810_s0 = inlined_call_operand.vmem [shape: f32[64,16], index: 0, kind: input, shape index: {}]   ;;  %s1811_s1 = inlined_call_operand.vmem [shape: f32[3,16,32], index: 1, kind: input, shape index: {}]   ;;  %s1812_s2 = inlined_call_operand.vmem [shape: f32[3,32,32], index: 2, kind: input, shape index: {}]   ;;  %s1813_s3 = inlined_call_operand.vmem [shape: f32[3,1,32], index: 3, kind: input, shape index: {}]   ;;  %s1814_s4 = inlined_call_operand.vmem [shape: f32[1,32], index: 4, kind: input, shape index: {}]   ;;  %s1815_s5 = inlined_call_operand.hbm [shape: f32[8,8,32], index: 5, kind: output, shape index: {}]  }
   0x1   :  { %v30_v0 = vld [vmem:[%s1811_s1 + $0x8] sm:$0xff]  ;;  %v1456_v1 = vld [vmem:[%s1812_s2 + $0x18] sm:$0xff]  ;;  %v29_v2 = vld [vmem:[%s1811_s1] sm:$0xff] }
   0x2   :  { %74 = vmatpush.msra.mxu0 %v30_v0  ;;  %261 = vmatpush.msra.mxu3 %v1456_v1  ;;  %v1465_v3 = vld [vmem:[%s1812_s2 + $0x10] sm:$0xff]  ;;  %v21_v4 = vld [vmem:[%s1810_s0] sm:$0xff]  ;;  %v1473_v5 = vld [vmem:[%s1812_s2 + $0x8] sm:$0xff] }
   0x3   :  { %v1243_v6 = vld [vmem:[%s1811_s1 + $0x18] sm:$0xff]  ;;  %v1242_v7 = vld [vmem:[%s1811_s1 + $0x10] sm:$0xff]  ;;  %v1486_v8 = vld [vmem:[%s1812_s2] sm:$0xff] }
   0x4   :  { %75 = vmatpush.msra.mxu0 %v29_v2  ;;  %262 = vmatpush.msra.mxu3 %v1465_v3  ;;  %v1254_v9 = vld [vmem:[%s1811_s1 + $0x28] sm:$0xff]  ;;  %v1495_v10 = vld [vmem:[%s1812_s2 + $0x58] sm:$0xff]  ;;  %v1253_v11 = vld [vmem:[%s1811_s1 + $0x20] sm:$0xff] }
   0x5   :  { %1234 = vmatmul.msk.f32.vlgmr.msra.gmra.mxu0 %vm35_vm0, %v21_v4  ;;  %132 = vmatpush.msra.mxu1 %v1243_v6  ;;  %v1503_v12 = vld [vmem:[%s1812_s2 + $0x38] sm:$0xff]  ;;  %v1511_v14 = vld [vmem:[%s1812_s2 + $0x30] sm:$0xff] }
   0x6   :  { %263 = vmatpush.msra.mxu3 %v1473_v5  ;;  %190 = vmatpush.msra.mxu2 %v1254_v9 }
   0x7   :  { %133 = vmatpush.msra.mxu1 %v1242_v7  ;;  %583 = vmatpush.msrb.mxu0 %v1495_v10 }
   0x8   :  { %264 = vmatpush.msra.mxu3 %v1486_v8  ;;  %1245 = vmatmul.msk.f32.vlgmr.msra.gmra.mxu1 %vm35_vm0, %v21_v4 }
   0x9   :  { %265 = vmatmul.f32.vlgmr.msra.gmra.mxu3 %v1416_v13  ;;  %191 = vmatpush.msra.mxu2 %v1253_v11 }
   0xa   :  { %10 = vsyncpa [#allocation4], 0  ;;  %281 = vmatpush.msrb.mxu3 %v1503_v12  ;;  %1256 = vmatmul.msk.f32.vlgmr.msra.gmra.mxu2 %vm35_vm0, %v21_v4  ;;  %v1518_v15 = vld [vmem:[%s1812_s2 + $0x50] sm:$0xff]  ;;  %v1523_v16 = vld [vmem:[%s1812_s2 + $0x28] sm:$0xff]  ;;  %vm101_vm1 = vcmask 261120   ;;  %s1417_s25 = smov [#allocation3]  }
   0xb   :  { %584 = vmatpush.msrb.mxu0 %v1518_v15  ;;  %623 = vmatpush.msrb.mxu1 %v1456_v1  ;;  %v1531_v17 = vld [vmem:[%s1812_s2 + $0x48] sm:$0xff]  ;;  %v1537_v18 = vld [vmem:[%s1812_s2 + $0x20] sm:$0xff]  ;;  %s1206_s28 = sshll.u32 %s1815_s5, 4  ;;  %s1418_s29 = smov 128   ;;  %s1207_s28 = int_to_ptr.hbm [resolvable:$true] %s1206_s28 }
   0xc   :  { %282 = vmatpush.msrb.mxu3 %v1511_v14  ;;  %643 = vmatpush.msrb.mxu2 %v1503_v12  ;;  %v1545_v19 = vld [vmem:[%s1812_s2 + $0x40] sm:$0xff]  ;;  %v22_v36 = vld [vmem:[%s1810_s0 + $0x8] sm:$0xff]  ;;  %s1419_s2 = smov 8  }
   0xd   :  { %585 = vmatpush.msrb.mxu0 %v1531_v17  ;;  %624 = vmatpush.msrb.mxu1 %v1465_v3  ;;  %v1581_v20 = vld [vmem:[%s1813_s3] ss:$0 sm:$0xff]  ;;  %v1586_v22 = vld [vmem:[%s1813_s3 + $0x1] ss:$0 sm:$0xff]  ;;  %v1595_v26 = vld [vmem:[%s1813_s3 + $0x2] ss:$0 sm:$0xff] }
   0xe   :  { %283 = vmatpush.msrb.mxu3 %v1523_v16  ;;  %644 = vmatpush.msrb.mxu2 %v1511_v14  ;;  %v1608_v45 = vld [vmem:[%s1814_s4] ss:$0 sm:$0xff] }
   0xf   :  { %586 = vmatpush.msrb.mxu0 %v1545_v19  ;;  %625 = vmatpush.msrb.mxu1 %v1473_v5 }
  0x10   :  { %284 = vmatpush.msrb.mxu3 %v1537_v18  ;;  %645 = vmatpush.msrb.mxu2 %v1523_v16 }
  0x11   :  { %285 = vmatmul.f32.vlgmr.msrb.gmra.mxu3 %v1416_v13  ;;  %626 = vmatpush.msrb.mxu1 %v1486_v8 }
  0x12   :  { %344 = vmatpush.msra.mxu3 %v1495_v10  ;;  %646 = vmatpush.msrb.mxu2 %v1537_v18 }
  0x13   :  { %743 = vmatpush.msra.mxu0 %v1456_v1  ;;  %763 = vmatpush.msra.mxu1 %v1503_v12 }
  0x14   :  { %345 = vmatpush.msra.mxu3 %v1518_v15  ;;  %823 = vmatpush.msra.mxu2 %v1495_v10 }
  0x15   :  { %744 = vmatpush.msra.mxu0 %v1465_v3  ;;  %764 = vmatpush.msra.mxu1 %v1511_v14 }
  0x16   :  { %346 = vmatpush.msra.mxu3 %v1531_v17  ;;  %824 = vmatpush.msra.mxu2 %v1518_v15 }
  0x17   :  { %745 = vmatpush.msra.mxu0 %v1473_v5  ;;  %765 = vmatpush.msra.mxu1 %v1523_v16 }
  0x18   :  { %347 = vmatpush.msra.mxu3 %v1545_v19  ;;  %825 = vmatpush.msra.mxu2 %v1531_v17 }
  0x19   :  { %348 = vmatmul.f32.vlgmr.msra.gmra.mxu3 %v1416_v13  ;;  %746 = vmatpush.msra.mxu0 %v1486_v8 }
  0x1a   :  { %383 = vmatpush.msrb.mxu3 %v1456_v1  ;;  %766 = vmatpush.msra.mxu1 %v1537_v18 }
  0x1b   :  { %826 = vmatpush.msra.mxu2 %v1545_v19  ;;  %1235 = vmatmul.msk.f32.gmra.mxu0 %vm35_vm0, %v22_v36 }
  0x1c   :  { %384 = vmatpush.msrb.mxu3 %v1465_v3  ;;  %1246 = vmatmul.msk.f32.gmra.mxu1 %vm35_vm0, %v22_v36 }
  0x1d   :  { %1257 = vmatmul.msk.f32.gmra.mxu2 %vm35_vm0, %v22_v36 }
  0x1e   :  { %385 = vmatpush.msrb.mxu3 %v1473_v5 }
  0x20   :  { %386 = vmatpush.msrb.mxu3 %v1486_v8 }
  0x22   :  { %403 = vmatpush.msra.mxu3 %v1503_v12 }
  0x24   :  { %404 = vmatpush.msra.mxu3 %v1511_v14 }
  0x26   :  { %405 = vmatpush.msra.mxu3 %v1523_v16 }
  0x28   :  { %406 = vmatpush.msra.mxu3 %v1537_v18 }
  0x82   :  { %v77_v21 = vpop.f32.mrf.mxu0 }
  0x83   :  { %v78_v23 = vadd.f32 %v1581_v20, %v77_v21 }
  0x85   :  { %102 = vst.msk [vmem:[#allocation2] sm:$0xff] %vm101_vm1, %v78_v23  ;;  %v135_v24 = vpop.f32.mrf.mxu1  ;;  %v23_v23 = vld [vmem:[%s1810_s0 + $0x10] sm:$0xff] }
  0x86   :  { %v136_v25 = vadd.f32 %v1586_v22, %v135_v24  ;;  %1236 = vmatmul.msk.f32.gmra.mxu0 %vm35_vm0, %v23_v23  ;;  %1247 = vmatmul.msk.f32.gmra.mxu1 %vm35_vm0, %v23_v23 }
  0x87   :  { %1258 = vmatmul.msk.f32.gmra.mxu2 %vm35_vm0, %v23_v23 }
  0x88   :  { %160 = vst.msk [vmem:[#allocation2 + $0x40] sm:$0xff] %vm101_vm1, %v136_v25 }
  0x8c   :  { %v239_v27 = vld [vmem:[#allocation2] sm:$0xff]  ;;  %v266_v28 = vpop.f32.mrf.mxu3 }
  0x8d   :  { %v289_v29 = vadd.f32 %v266_v28, %v239_v27  ;;  %v193_v30 = vpop.f32.mrf.mxu2 }
  0x8e   :  { %v194_v31 = vadd.f32 %v1595_v26, %v193_v30  ;;  %v25_v30 = vld [vmem:[%s1810_s0 + $0x20] sm:$0xff] }
  0x8f   :  { %v1264_v32 = vmul.f32 -1.442695, %v289_v29  ;;  %v242_v33 = vld [vmem:[#allocation2 + $0x40] sm:$0xff]  ;;  %v24_v29 = vld [vmem:[%s1810_s0 + $0x18] sm:$0xff] }
  0x90   :  { %218 = vst.msk [vmem:[#allocation2 + $0x80] sm:$0xff] %vm101_vm1, %v194_v31  ;;  %1237 = vmatmul.msk.f32.gmra.mxu0 %vm35_vm0, %v24_v29  ;;  %1248 = vmatmul.msk.f32.gmra.mxu1 %vm35_vm0, %v24_v29  ;;  %v26_v31 = vld [vmem:[%s1810_s0 + $0x28] sm:$0xff] }
  0x91   :  { %1309 = vpow2.f32 %v1264_v32  ;;  %1259 = vmatmul.msk.f32.gmra.mxu2 %vm35_vm0, %v24_v29 }
  0x94   :  { %v286_v34 = vpop.f32.mrf.mxu3 }
  0x95   :  { %v309_v35 = vadd.f32 %v286_v34, %v242_v33  ;;  %v27_v34 = vld [vmem:[%s1810_s0 + $0x30] sm:$0xff] }
  0x97   :  { %v1310_v37 = vpop.eup %1309  ;;  %v1265_v38 = vmul.f32 -1.442695, %v309_v35  ;;  %v245_v56 = vld [vmem:[#allocation2 + $0x80] sm:$0xff] }
  0x98   :  { %v293_v39 = vadd.f32 1.0, %v1310_v37  ;;  %v80_v24 = vpop.f32.mrf.mxu0  ;;  %1238 = vmatmul.msk.f32.gmra.mxu0 %vm35_vm0, %v25_v30  ;;  %1249 = vmatmul.msk.f32.gmra.mxu1 %vm35_vm0, %v25_v30 }
  0x99   :  { %1311 = vpow2.f32 %v1265_v38  ;;  %v138_v25 = vpop.f32.mrf.mxu1  ;;  %v81_v27 = vadd.f32 %v1581_v20, %v80_v24  ;;  %1260 = vmatmul.msk.f32.gmra.mxu2 %vm35_vm0, %v25_v30 }
  0x9a   :  { %1313 = vrcp.f32 %v293_v39  ;;  %v305_v46 = vand.u32 2147483648, %v293_v39  ;;  %v303_v49 = vand.u32 2147483647, %v293_v39  ;;  %vm299_vm3 = vweird.f32 %v293_v39 }
  0x9b   :  { %v139_v28 = vadd.f32 %v1586_v22, %v138_v25  ;;  %103 = vst.msk [vmem:[#allocation2 + $0x8] sm:$0xff] %vm101_vm1, %v81_v27 }
  0x9c   :  { %v349_v47 = vpop.f32.mrf.mxu3  ;;  %v306_v53 = vor.u32 1.1754944e-38, %v305_v46  ;;  %vm304_vm5 = vcmp.eq.f32.partialorder %v303_v49, 8.507059e+37 }
  0x9d   :  { %v350_v51 = vadd.f32 %v1608_v45, %v349_v47  ;;  %161 = vst.msk [vmem:[#allocation2 + $0x48] sm:$0xff] %vm101_vm1, %v139_v28 }
  0x9f   :  { %v1312_v40 = vpop.eup %1311 }
  0xa0   :  { %v1314_v41 = vpop.eup %1313  ;;  %v313_v42 = vadd.f32 1.0, %v1312_v40  ;;  %1239 = vmatmul.msk.f32.gmra.mxu0 %vm35_vm0, %v26_v31  ;;  %v196_v32 = vpop.f32.mrf.mxu2  ;;  %1250 = vmatmul.msk.f32.gmra.mxu1 %vm35_vm0, %v26_v31 }
  0xa1   :  { %v295_v43 = vmul.f32 %v1314_v41, %v293_v39  ;;  %vm300_vm2 = vweird.f32 %v1314_v41  ;;  %v197_v33 = vadd.f32 %v1595_v26, %v196_v32  ;;  %1261 = vmatmul.msk.f32.gmra.mxu2 %vm35_vm0, %v26_v31  ;;  %v28_v39 = vld [vmem:[%s1810_s0 + $0x38] sm:$0xff] }
  0xa2   :  { %1315 = vrcp.f32 %v313_v42  ;;  %vm301_vm4 = vmor %vm299_vm3, %vm300_vm2  ;;  %v325_v60 = vand.u32 2147483648, %v313_v42  ;;  %v323_v62 = vand.u32 2147483647, %v313_v42  ;;  %vm319_vm7 = vweird.f32 %v313_v42  ;;  %v361_v35 = vld [vmem:[#allocation2 + $0x8] sm:$0xff] }
  0xa3   :  { %v296_v44 = vsub.f32 1.0, %v295_v43  ;;  %219 = vst.msk [vmem:[#allocation2 + $0x88] sm:$0xff] %vm101_vm1, %v197_v33 }
  0xa4   :  { %v326_v2 = vor.u32 1.1754944e-38, %v325_v60  ;;  %vm324_vm9 = vcmp.eq.f32.partialorder %v323_v62, 8.507059e+37  ;;  %v364_v40 = vld [vmem:[#allocation2 + $0x48] sm:$0xff] }
  0xa5   :  { %v297_v48 = vmul.f32 %v1314_v41, %v296_v44 }
  0xa7   :  { %v298_v50 = vadd.f32 %v1314_v41, %v297_v48 }
  0xa8   :  { %v1316_v52 = vpop.eup %1315  ;;  %1240 = vmatmul.msk.f32.gmra.mxu0 %vm35_vm0, %v27_v34  ;;  %1251 = vmatmul.msk.f32.gmra.mxu1 %vm35_vm0, %v27_v34 }
  0xa9   :  { %v315_v54 = vmul.f32 %v1316_v52, %v313_v42  ;;  %v302_v55 = vsel %vm301_vm4, %v1314_v41, %v298_v50  ;;  %vm320_vm6 = vweird.f32 %v1316_v52  ;;  %1262 = vmatmul.msk.f32.gmra.mxu2 %vm35_vm0, %v27_v34 }
  0xaa   :  { %v307_v57 = vsel %vm304_vm5, %v306_v53, %v302_v55  ;;  %vm321_vm8 = vmor %vm319_vm7, %vm320_vm6 }
  0xab   :  { %v316_v58 = vsub.f32 1.0, %v315_v54  ;;  %v352_v59 = vmul.f32 %v350_v51, %v307_v57 }
  0xad   :  { %v317_v61 = vmul.f32 %v1316_v52, %v316_v58  ;;  %v353_v63 = vadd.f32 %v352_v59, %v245_v56 }
  0xaf   :  { %v318_v0 = vadd.f32 %v1316_v52, %v317_v61  ;;  %1317 = vtanh.f32 %v353_v63  ;;  %v367_v63 = vld [vmem:[#allocation2 + $0x88] sm:$0xff] }
  0xb0   :  { %1241 = vmatmul.msk.f32.gmra.mxu0 %vm35_vm0, %v28_v39  ;;  %1252 = vmatmul.msk.f32.gmra.mxu1 %vm35_vm0, %v28_v39 }
  0xb1   :  { %v322_v4 = vsel %vm321_vm8, %v1316_v52, %v318_v0  ;;  %1263 = vmatmul.msk.f32.gmra.mxu2 %vm35_vm0, %v28_v39 }
  0xb2   :  { %v327_v6 = vsel %vm324_vm9, %v326_v2, %v322_v4 }
  0xb3   :  { %v355_v7 = vsub.f32 1.0, %v327_v6  ;;  %v357_v13 = vmul.f32 0.0, %v327_v6 }
  0xb5   :  { %v1318_v9 = vpop.eup %1317 }
  0xb6   :  { %v356_v11 = vmul.f32 %v1318_v9, %v355_v7 }
  0xb8   :  { %v1611_v21 = vadd.f32 %v357_v13, %v356_v11 }
  0xba   :  { %359 = vst.msk [vmem:[#allocation3] sm:$0xff] %vm101_vm1, %v1611_v21  ;;  %1266 = vmatmul.msk.f32.vlgmr.msrb.gmra.mxu3 %vm101_vm1, %v1611_v21 }
  0xbb   :  { %463 = vmatpush.msrb.mxu3 %v1495_v10 }
  0xbd   :  { %464 = vmatpush.msrb.mxu3 %v1518_v15 }
  0xbf   :  { %465 = vmatpush.msrb.mxu3 %v1531_v17 }
  0xc1   :  { %466 = vmatpush.msrb.mxu3 %v1545_v19 }
  0xc2   :  { %1267 = vmatmul.msk.f32.vlgmr.msra.gmra.mxu3 %vm101_vm1, %v1611_v21 }
  0xc3   :  { %503 = vmatpush.msra.mxu3 %v1456_v1 }
  0xc5   :  { %504 = vmatpush.msra.mxu3 %v1465_v3 }
  0xc7   :  { %505 = vmatpush.msra.mxu3 %v1473_v5 }
  0xc9   :  { %506 = vmatpush.msra.mxu3 %v1486_v8 }
  0xca   :  { %1270 = vmatmul.msk.f32.vlgmr.msrb.gmra.mxu3 %vm101_vm1, %v1611_v21 }
  0xcb   :  { %523 = vmatpush.msrb.mxu3 %v1503_v12 }
  0xcd   :  { %524 = vmatpush.msrb.mxu3 %v1511_v14 }
  0xcf   :  { %525 = vmatpush.msrb.mxu3 %v1523_v16 }
  0xd1   :  { %526 = vmatpush.msrb.mxu3 %v1537_v18 }
 0x13d   :  { %v388_v36 = vpop.f32.mrf.mxu3 }
 0x13e   :  { %v411_v37 = vadd.f32 %v388_v36, %v361_v35 }
 0x140   :  { %v1268_v38 = vmul.f32 -1.442695, %v411_v37 }
 0x142   :  { %1319 = vpow2.f32 %v1268_v38 }
 0x145   :  { %v408_v41 = vpop.f32.mrf.mxu3 }
 0x146   :  { %v431_v42 = vadd.f32 %v408_v41, %v364_v40 }
 0x148   :  { %v1320_v43 = vpop.eup %1319  ;;  %v1269_v44 = vmul.f32 -1.442695, %v431_v42  ;;  %v141_v42 = vpop.f32.mrf.mxu1 }
 0x149   :  { %v415_v46 = vadd.f32 1.0, %v1320_v43  ;;  %v142_v43 = vadd.f32 %v1586_v22, %v141_v42 }
 0x14a   :  { %1321 = vpow2.f32 %v1269_v44  ;;  %v199_v44 = vpop.f32.mrf.mxu2 }
 0x14b   :  { %1323 = vrcp.f32 %v415_v46  ;;  %v427_v52 = vand.u32 2147483648, %v415_v46  ;;  %v425_v54 = vand.u32 2147483647, %v415_v46  ;;  %vm421_vm11 = vweird.f32 %v415_v46  ;;  %162 = vst.msk [vmem:[#allocation2 + $0x50] sm:$0xff] %vm101_vm1, %v142_v43 }
 0x14d   :  { %v468_v55 = vpop.f32.mrf.mxu3  ;;  %v428_v58 = vor.u32 1.1754944e-38, %v427_v52  ;;  %vm426_vm13 = vcmp.eq.f32.partialorder %v425_v54, 8.507059e+37 }
 0x14e   :  { %v469_v61 = vadd.f32 %v1608_v45, %v468_v55 }
 0x150   :  { %v1322_v47 = vpop.eup %1321 }
 0x151   :  { %v1324_v48 = vpop.eup %1323  ;;  %v435_v49 = vadd.f32 1.0, %v1322_v47 }
 0x152   :  { %v417_v50 = vmul.f32 %v1324_v48, %v415_v46  ;;  %vm422_vm10 = vweird.f32 %v1324_v48  ;;  %v200_v46 = vadd.f32 %v1595_v26, %v199_v44 }
 0x153   :  { %1325 = vrcp.f32 %v435_v49  ;;  %vm423_vm12 = vmor %vm421_vm11, %vm422_vm10  ;;  %v447_v4 = vand.u32 2147483648, %v435_v49  ;;  %v445_v7 = vand.u32 2147483647, %v435_v49  ;;  %vm441_vm15 = vweird.f32 %v435_v49 }
 0x154   :  { %v418_v51 = vsub.f32 1.0, %v417_v50  ;;  %220 = vst.msk [vmem:[#allocation2 + $0x90] sm:$0xff] %vm101_vm1, %v200_v46 }
 0x155   :  { %v448_v13 = vor.u32 1.1754944e-38, %v447_v4  ;;  %vm446_vm2 = vcmp.eq.f32.partialorder %v445_v7, 8.507059e+37 }
 0x156   :  { %v419_v53 = vmul.f32 %v1324_v48, %v418_v51  ;;  %v484_v51 = vld [vmem:[#allocation2 + $0x50] sm:$0xff] }
 0x158   :  { %v420_v56 = vadd.f32 %v1324_v48, %v419_v53 }
 0x159   :  { %v1326_v57 = vpop.eup %1325 }
 0x15a   :  { %v437_v59 = vmul.f32 %v1326_v57, %v435_v49  ;;  %v424_v60 = vsel %vm423_vm12, %v1324_v48, %v420_v56  ;;  %vm442_vm14 = vweird.f32 %v1326_v57  ;;  %v144_v56 = vpop.f32.mrf.mxu1 }
 0x15b   :  { %v429_v62 = vsel %vm426_vm13, %v428_v58, %v424_v60  ;;  %vm443_vm0 = vmor %vm441_vm15, %vm442_vm14  ;;  %v145_v58 = vadd.f32 %v1586_v22, %v144_v56 }
 0x15c   :  { %v438_v0 = vsub.f32 1.0, %v437_v59  ;;  %v471_v2 = vmul.f32 %v469_v61, %v429_v62 }
 0x15d   :  { %163 = vst.msk [vmem:[#allocation2 + $0x58] sm:$0xff] %vm101_vm1, %v145_v58 }
 0x15e   :  { %v439_v6 = vmul.f32 %v1326_v57, %v438_v0  ;;  %v472_v9 = vadd.f32 %v471_v2, %v367_v63 }
 0x160   :  { %v440_v11 = vadd.f32 %v1326_v57, %v439_v6  ;;  %1327 = vtanh.f32 %v472_v9 }
 0x162   :  { %v444_v23 = vsel %vm443_vm0, %v1326_v57, %v440_v11  ;;  %v202_v57 = vpop.f32.mrf.mxu2  ;;  %v147_v2 = vpop.f32.mrf.mxu1 }
 0x163   :  { %v449_v24 = vsel %vm446_vm2, %v448_v13, %v444_v23  ;;  %v203_v59 = vadd.f32 %v1595_v26, %v202_v57  ;;  %v148_v7 = vadd.f32 %v1586_v22, %v147_v2 }
 0x164   :  { %v474_v25 = vsub.f32 1.0, %v449_v24  ;;  %v476_v29 = vmul.f32 %v449_v24, %v1611_v21  ;;  %v83_v21 = vpop.f32.mrf.mxu0 }
 0x165   :  { %v84_v31 = vadd.f32 %v1581_v20, %v83_v21  ;;  %221 = vst.msk [vmem:[#allocation2 + $0x98] sm:$0xff] %vm101_vm1, %v203_v59 }
 0x166   :  { %v1328_v27 = vpop.eup %1327  ;;  %164 = vst.msk [vmem:[#allocation2 + $0x60] sm:$0xff] %vm101_vm1, %v148_v7 }
 0x167   :  { %v475_v28 = vmul.f32 %v1328_v27, %v474_v25  ;;  %104 = vst.msk [vmem:[#allocation2 + $0x10] sm:$0xff] %vm101_vm1, %v84_v31 }
 0x169   :  { %v1677_v30 = vadd.f32 %v476_v29, %v475_v28 }
 0x16a   :  { %v205_v4 = vpop.f32.mrf.mxu2 }
 0x16b   :  { %479 = vst.msk [vmem:[#allocation3 + $0x8] sm:$0xff] %vm101_vm1, %v1677_v30  ;;  %1271 = vmatmul.msk.f32.vlgmr.msra.gmra.mxu3 %vm101_vm1, %v1677_v30  ;;  %1275 = vmatmul.msk.f32.vlgmr.msrb.gmra.mxu0 %vm101_vm1, %v1677_v30  ;;  %v206_v9 = vadd.f32 %v1595_v26, %v205_v4 }
 0x16c   :  { %703 = vmatpush.msra.mxu3 %v1495_v10  ;;  %883 = vmatpush.msrb.mxu0 %v1503_v12  ;;  %v86_v32 = vpop.f32.mrf.mxu0 }
 0x16d   :  { %v87_v33 = vadd.f32 %v1581_v20, %v86_v32  ;;  %222 = vst.msk [vmem:[#allocation2 + $0xa0] sm:$0xff] %vm101_vm1, %v206_v9  ;;  %v487_v32 = vld [vmem:[#allocation2 + $0x90] sm:$0xff] }
 0x16e   :  { %704 = vmatpush.msra.mxu3 %v1518_v15  ;;  %884 = vmatpush.msrb.mxu0 %v1511_v14  ;;  %v481_v47 = vld [vmem:[#allocation2 + $0x10] sm:$0xff] }
 0x16f   :  { %105 = vst.msk [vmem:[#allocation2 + $0x18] sm:$0xff] %vm101_vm1, %v87_v33 }
 0x170   :  { %705 = vmatpush.msra.mxu3 %v1531_v17  ;;  %885 = vmatpush.msrb.mxu0 %v1523_v16 }
 0x172   :  { %706 = vmatpush.msra.mxu3 %v1545_v19  ;;  %886 = vmatpush.msrb.mxu0 %v1537_v18 }
 0x173   :  { %1272 = vmatmul.msk.f32.vlgmr.msrb.gmra.mxu3 %vm101_vm1, %v1677_v30 }
 0x174   :  { %863 = vmatpush.msrb.mxu3 %v1456_v1  ;;  %v89_v34 = vpop.f32.mrf.mxu0 }
 0x175   :  { %v90_v35 = vadd.f32 %v1581_v20, %v89_v34 }
 0x176   :  { %864 = vmatpush.msrb.mxu3 %v1465_v3 }
 0x177   :  { %106 = vst.msk [vmem:[#allocation2 + $0x20] sm:$0xff] %vm101_vm1, %v90_v35  ;;  %v150_v35 = vpop.f32.mrf.mxu1 }
 0x178   :  { %865 = vmatpush.msrb.mxu3 %v1473_v5 }
 0x17a   :  { %866 = vmatpush.msrb.mxu3 %v1486_v8 }
 0x17c   :  { %v92_v36 = vpop.f32.mrf.mxu0 }
 0x17d   :  { %v93_v37 = vadd.f32 %v1581_v20, %v92_v36  ;;  %v208_v36 = vpop.f32.mrf.mxu2 }
 0x17f   :  { %107 = vst.msk [vmem:[#allocation2 + $0x28] sm:$0xff] %vm101_vm1, %v93_v37 }
 0x184   :  { %v95_v38 = vpop.f32.mrf.mxu0 }
 0x185   :  { %v96_v39 = vadd.f32 %v1581_v20, %v95_v38  ;;  %v151_v38 = vadd.f32 %v1586_v22, %v150_v35 }
 0x187   :  { %108 = vst.msk [vmem:[#allocation2 + $0x30] sm:$0xff] %vm101_vm1, %v96_v39  ;;  %v209_v39 = vadd.f32 %v1595_v26, %v208_v36 }
 0x188   :  { %165 = vst.msk [vmem:[#allocation2 + $0x68] sm:$0xff] %vm101_vm1, %v151_v38 }
 0x189   :  { %223 = vst.msk [vmem:[#allocation2 + $0xa8] sm:$0xff] %vm101_vm1, %v209_v39 }
 0x18c   :  { %v98_v40 = vpop.f32.mrf.mxu0 }
 0x18d   :  { %v99_v41 = vadd.f32 %v1581_v20, %v98_v40 }
 0x18f   :  { %109 = vst.msk [vmem:[#allocation2 + $0x38] sm:$0xff] %vm101_vm1, %v99_v41 }
 0x1e8   :  { %v588_v23 = vpop.f32.mrf.mxu0 }
 0x1e9   :  { %v589_v28 = vadd.f32 %v1608_v45, %v588_v23 }
 0x1ee   :  { %v508_v48 = vpop.f32.mrf.mxu3 }
 0x1ef   :  { %v531_v49 = vadd.f32 %v508_v48, %v481_v47 }
 0x1f1   :  { %v1273_v50 = vmul.f32 -1.442695, %v531_v49  ;;  %v153_v49 = vpop.f32.mrf.mxu1 }
 0x1f3   :  { %1329 = vpow2.f32 %v1273_v50  ;;  %v211_v50 = vpop.f32.mrf.mxu2 }
 0x1f6   :  { %v528_v52 = vpop.f32.mrf.mxu3 }
 0x1f7   :  { %v551_v20 = vadd.f32 %v528_v52, %v484_v51  ;;  %v154_v51 = vadd.f32 %v1586_v22, %v153_v49  ;;  %v212_v52 = vadd.f32 %v1595_v26, %v211_v50 }
 0x1f9   :  { %v1330_v53 = vpop.eup %1329  ;;  %v1274_v54 = vmul.f32 -1.442695, %v551_v20  ;;  %166 = vst.msk [vmem:[#allocation2 + $0x70] sm:$0xff] %vm101_vm1, %v154_v51  ;;  %v156_v56 = vpop.f32.mrf.mxu1 }
 0x1fa   :  { %v535_v55 = vadd.f32 1.0, %v1330_v53  ;;  %224 = vst.msk [vmem:[#allocation2 + $0xb0] sm:$0xff] %vm101_vm1, %v212_v52  ;;  %v157_v57 = vadd.f32 %v1586_v22, %v156_v56  ;;  %v601_v22 = vld [vmem:[#allocation2 + $0x18] sm:$0xff]  ;;  %v724_v52 = vld [vmem:[#allocation2 + $0x60] sm:$0xff] }
 0x1fb   :  { %1331 = vpow2.f32 %v1274_v54 }
 0x1fc   :  { %1333 = vrcp.f32 %v535_v55  ;;  %v547_v6 = vand.u32 2147483648, %v535_v55  ;;  %v545_v13 = vand.u32 2147483647, %v535_v55  ;;  %vm541_vm4 = vweird.f32 %v535_v55  ;;  %167 = vst.msk [vmem:[#allocation2 + $0x78] sm:$0xff] %vm101_vm1, %v157_v57 }
 0x1fe   :  { %v548_v27 = vor.u32 1.1754944e-38, %v547_v6  ;;  %vm546_vm6 = vcmp.eq.f32.partialorder %v545_v13, 8.507059e+37 }
 0x201   :  { %v1332_v60 = vpop.eup %1331 }
 0x202   :  { %v1334_v61 = vpop.eup %1333  ;;  %v555_v62 = vadd.f32 1.0, %v1332_v60 }
 0x203   :  { %v537_v63 = vmul.f32 %v1334_v61, %v535_v55  ;;  %vm542_vm3 = vweird.f32 %v1334_v61 }
 0x204   :  { %1335 = vrcp.f32 %v555_v62  ;;  %vm543_vm5 = vmor %vm541_vm4, %vm542_vm3  ;;  %v567_v37 = vand.u32 2147483648, %v555_v62  ;;  %v565_v41 = vand.u32 2147483647, %v555_v62  ;;  %vm561_vm8 = vweird.f32 %v555_v62 }
 0x205   :  { %v538_v0 = vsub.f32 1.0, %v537_v63 }
 0x206   :  { %v568_v44 = vor.u32 1.1754944e-38, %v567_v37  ;;  %vm566_vm10 = vcmp.eq.f32.partialorder %v565_v41, 8.507059e+37 }
 0x207   :  { %v539_v11 = vmul.f32 %v1334_v61, %v538_v0 }
 0x209   :  { %v540_v24 = vadd.f32 %v1334_v61, %v539_v11 }
 0x20a   :  { %v1336_v25 = vpop.eup %1335 }
 0x20b   :  { %v544_v29 = vsel %vm543_vm5, %v1334_v61, %v540_v24  ;;  %v557_v21 = vmul.f32 %v1336_v25, %v555_v62  ;;  %vm562_vm7 = vweird.f32 %v1336_v25  ;;  %v604_v61 = vld [vmem:[#allocation2 + $0x58] sm:$0xff] }
 0x20c   :  { %v549_v31 = vsel %vm546_vm6, %v548_v27, %v544_v29  ;;  %vm563_vm9 = vmor %vm561_vm8, %vm562_vm7 }
 0x20d   :  { %v591_v33 = vmul.f32 %v589_v28, %v549_v31  ;;  %v558_v34 = vsub.f32 1.0, %v557_v21 }
 0x20f   :  { %v559_v40 = vmul.f32 %v1336_v25, %v558_v34  ;;  %v592_v42 = vadd.f32 %v591_v33, %v487_v32 }
 0x211   :  { %v560_v43 = vadd.f32 %v1336_v25, %v559_v40  ;;  %1337 = vtanh.f32 %v592_v42  ;;  %v607_v40 = vld [vmem:[#allocation2 + $0x98] sm:$0xff] }
 0x213   :  { %v564_v46 = vsel %vm563_vm9, %v1336_v25, %v560_v43 }
 0x214   :  { %v569_v47 = vsel %vm566_vm10, %v568_v44, %v564_v46 }
 0x215   :  { %v594_v48 = vsub.f32 1.0, %v569_v47  ;;  %v596_v54 = vmul.f32 %v569_v47, %v1677_v30  ;;  %v214_v30 = vpop.f32.mrf.mxu2 }
 0x216   :  { %v215_v58 = vadd.f32 %v1595_v26, %v214_v30 }
 0x217   :  { %v1338_v20 = vpop.eup %1337 }
 0x218   :  { %v595_v53 = vmul.f32 %v1338_v20, %v594_v48  ;;  %225 = vst.msk [vmem:[#allocation2 + $0xb8] sm:$0xff] %vm101_vm1, %v215_v58 }
 0x21a   :  { %v1733_v55 = vadd.f32 %v596_v54, %v595_v53 }
 0x21c   :  { %599 = vst.msk [vmem:[#allocation3 + $0x10] sm:$0xff] %vm101_vm1, %v1733_v55  ;;  %1276 = vmatmul.msk.f32.vlgmr.msrb.gmra.mxu1 %vm101_vm1, %v1733_v55  ;;  %1277 = vmatmul.msk.f32.vlgmr.msrb.gmra.mxu2 %vm101_vm1, %v1733_v55 }
 0x21d   :  { %1280 = vmatmul.msk.f32.vlgmr.msra.gmra.mxu3 %vm101_vm1, %v1733_v55  ;;  %943 = vmatpush.msrb.mxu1 %v1495_v10 }
 0x21e   :  { %983 = vmatpush.msrb.mxu2 %v1456_v1  ;;  %1003 = vmatpush.msra.mxu3 %v1503_v12 }
 0x21f   :  { %944 = vmatpush.msrb.mxu1 %v1518_v15 }
 0x220   :  { %984 = vmatpush.msrb.mxu2 %v1465_v3  ;;  %1004 = vmatpush.msra.mxu3 %v1511_v14 }
 0x221   :  { %945 = vmatpush.msrb.mxu1 %v1531_v17 }
 0x222   :  { %985 = vmatpush.msrb.mxu2 %v1473_v5  ;;  %1005 = vmatpush.msra.mxu3 %v1523_v16 }
 0x223   :  { %946 = vmatpush.msrb.mxu1 %v1545_v19 }
 0x224   :  { %986 = vmatpush.msrb.mxu2 %v1486_v8  ;;  %1006 = vmatpush.msra.mxu3 %v1537_v18 }
 0x299   :  { %v628_v26 = vpop.f32.mrf.mxu1 }
 0x29a   :  { %v651_v59 = vadd.f32 %v628_v26, %v601_v22 }
 0x29c   :  { %v1278_v60 = vmul.f32 -1.442695, %v651_v59 }
 0x29e   :  { %1339 = vpow2.f32 %v1278_v60 }
 0x29f   :  { %v648_v62 = vpop.f32.mrf.mxu2 }
 0x2a0   :  { %v671_v63 = vadd.f32 %v648_v62, %v604_v61  ;;  %v708_v28 = vpop.f32.mrf.mxu3 }
 0x2a1   :  { %v709_v34 = vadd.f32 %v1608_v45, %v708_v28 }
 0x2a2   :  { %v1279_v0 = vmul.f32 -1.442695, %v671_v63 }
 0x2a4   :  { %v1340_v2 = vpop.eup %1339  ;;  %1341 = vpow2.f32 %v1279_v0 }
 0x2a5   :  { %v655_v4 = vadd.f32 1.0, %v1340_v2 }
 0x2a7   :  { %1343 = vrcp.f32 %v655_v4  ;;  %v667_v23 = vand.u32 2147483648, %v655_v4  ;;  %v665_v25 = vand.u32 2147483647, %v655_v4  ;;  %vm661_vm12 = vweird.f32 %v655_v4 }
 0x2a9   :  { %v668_v31 = vor.u32 1.1754944e-38, %v667_v23  ;;  %vm666_vm14 = vcmp.eq.f32.partialorder %v665_v25, 8.507059e+37  ;;  %v727_v23 = vld [vmem:[#allocation2 + $0xa0] sm:$0xff] }
 0x2aa   :  { %v1342_v6 = vpop.eup %1341 }
 0x2ab   :  { %v675_v7 = vadd.f32 1.0, %v1342_v6 }
 0x2ad   :  { %v1344_v9 = vpop.eup %1343  ;;  %1345 = vrcp.f32 %v675_v7  ;;  %v687_v37 = vand.u32 2147483648, %v675_v7  ;;  %v685_v39 = vand.u32 2147483647, %v675_v7  ;;  %vm681_vm0 = vweird.f32 %v675_v7 }
 0x2ae   :  { %v657_v11 = vmul.f32 %v1344_v9, %v655_v4  ;;  %vm662_vm11 = vweird.f32 %v1344_v9 }
 0x2af   :  { %vm663_vm13 = vmor %vm661_vm12, %vm662_vm11  ;;  %v688_v43 = vor.u32 1.1754944e-38, %v687_v37  ;;  %vm686_vm3 = vcmp.eq.f32.partialorder %v685_v39, 8.507059e+37 }
 0x2b0   :  { %v658_v13 = vsub.f32 1.0, %v657_v11 }
 0x2b2   :  { %v659_v24 = vmul.f32 %v1344_v9, %v658_v13 }
 0x2b3   :  { %v1346_v27 = vpop.eup %1345 }
 0x2b4   :  { %v677_v29 = vmul.f32 %v1346_v27, %v675_v7  ;;  %v660_v21 = vadd.f32 %v1344_v9, %v659_v24  ;;  %vm682_vm15 = vweird.f32 %v1346_v27 }
 0x2b5   :  { %vm683_vm2 = vmor %vm681_vm0, %vm682_vm15 }
 0x2b6   :  { %v678_v32 = vsub.f32 1.0, %v677_v29  ;;  %v664_v33 = vsel %vm663_vm13, %v1344_v9, %v660_v21 }
 0x2b7   :  { %v669_v35 = vsel %vm666_vm14, %v668_v31, %v664_v33 }
 0x2b8   :  { %v679_v36 = vmul.f32 %v1346_v27, %v678_v32  ;;  %v711_v38 = vmul.f32 %v709_v34, %v669_v35  ;;  %v844_v34 = vld [vmem:[#allocation2 + $0x68] sm:$0xff] }
 0x2ba   :  { %v680_v41 = vadd.f32 %v1346_v27, %v679_v36  ;;  %v712_v42 = vadd.f32 %v711_v38, %v607_v40  ;;  %v841_v38 = vld [vmem:[#allocation2 + $0x28] sm:$0xff] }
 0x2bc   :  { %v684_v44 = vsel %vm683_vm2, %v1346_v27, %v680_v41  ;;  %1347 = vtanh.f32 %v712_v42 }
 0x2bd   :  { %v689_v46 = vsel %vm686_vm3, %v688_v43, %v684_v44 }
 0x2be   :  { %v714_v47 = vsub.f32 1.0, %v689_v46  ;;  %v716_v50 = vmul.f32 %v689_v46, %v1733_v55 }
 0x2c2   :  { %v1348_v48 = vpop.eup %1347 }
 0x2c3   :  { %v715_v49 = vmul.f32 %v1348_v48, %v714_v47 }
 0x2c5   :  { %v1761_v51 = vadd.f32 %v716_v50, %v715_v49 }
 0x2c7   :  { %719 = vst.msk [vmem:[#allocation3 + $0x18] sm:$0xff] %vm101_vm1, %v1761_v51  ;;  %1281 = vmatmul.msk.f32.vlgmr.msra.gmra.mxu0 %vm101_vm1, %v1761_v51  ;;  %1282 = vmatmul.msk.f32.vlgmr.msra.gmra.mxu1 %vm101_vm1, %v1761_v51 }
 0x2c8   :  { %1285 = vmatmul.msk.f32.vlgmr.msra.gmra.mxu2 %vm101_vm1, %v1761_v51  ;;  %1063 = vmatpush.msra.mxu0 %v1495_v10 }
 0x2c9   :  { %1103 = vmatpush.msra.mxu1 %v1456_v1  ;;  %1123 = vmatpush.msra.mxu2 %v1503_v12  ;;  %v721_v1 = vld [vmem:[#allocation2 + $0x20] sm:$0xff] }
 0x2ca   :  { %1064 = vmatpush.msra.mxu0 %v1518_v15 }
 0x2cb   :  { %1104 = vmatpush.msra.mxu1 %v1465_v3  ;;  %1124 = vmatpush.msra.mxu2 %v1511_v14 }
 0x2cc   :  { %1065 = vmatpush.msra.mxu0 %v1531_v17 }
 0x2cd   :  { %1105 = vmatpush.msra.mxu1 %v1473_v5  ;;  %1125 = vmatpush.msra.mxu2 %v1523_v16 }
 0x2ce   :  { %1066 = vmatpush.msra.mxu0 %v1545_v19 }
 0x2cf   :  { %1106 = vmatpush.msra.mxu1 %v1486_v8  ;;  %1126 = vmatpush.msra.mxu2 %v1537_v18 }
 0x344   :  { %v748_v12 = vpop.f32.mrf.mxu0  ;;  %v768_v20 = vpop.f32.mrf.mxu1 }
 0x345   :  { %v771_v53 = vadd.f32 %v748_v12, %v721_v1  ;;  %v791_v3 = vadd.f32 %v768_v20, %v724_v52 }
 0x347   :  { %v1283_v54 = vmul.f32 -1.442695, %v771_v53  ;;  %v1284_v14 = vmul.f32 -1.442695, %v791_v3 }
 0x349   :  { %1349 = vpow2.f32 %v1283_v54 }
 0x34a   :  { %1351 = vpow2.f32 %v1284_v14 }
 0x34b   :  { %v828_v62 = vpop.f32.mrf.mxu2 }
 0x34c   :  { %v829_v4 = vadd.f32 %v1608_v45, %v828_v62 }
 0x34f   :  { %v1350_v55 = vpop.eup %1349 }
 0x350   :  { %v1352_v5 = vpop.eup %1351  ;;  %v775_v56 = vadd.f32 1.0, %v1350_v55 }
 0x351   :  { %v795_v16 = vadd.f32 1.0, %v1352_v5 }
 0x352   :  { %1353 = vrcp.f32 %v775_v56  ;;  %v787_v26 = vand.u32 2147483648, %v775_v56  ;;  %v785_v60 = vand.u32 2147483647, %v775_v56  ;;  %vm781_vm5 = vweird.f32 %v775_v56 }
 0x353   :  { %1355 = vrcp.f32 %v795_v16  ;;  %v807_v9 = vand.u32 2147483648, %v795_v16  ;;  %vm801_vm9 = vweird.f32 %v795_v16  ;;  %v805_v13 = vand.u32 2147483647, %v795_v16 }
 0x354   :  { %v788_v0 = vor.u32 1.1754944e-38, %v787_v26  ;;  %vm786_vm7 = vcmp.eq.f32.partialorder %v785_v60, 8.507059e+37 }
 0x355   :  { %v808_v27 = vor.u32 1.1754944e-38, %v807_v9  ;;  %vm806_vm11 = vcmp.eq.f32.partialorder %v805_v13, 8.507059e+37 }
 0x358   :  { %v1354_v30 = vpop.eup %1353 }
 0x359   :  { %v1356_v8 = vpop.eup %1355  ;;  %v777_v57 = vmul.f32 %v1354_v30, %v775_v56  ;;  %vm782_vm4 = vweird.f32 %v1354_v30 }
 0x35a   :  { %v797_v18 = vmul.f32 %v1356_v8, %v795_v16  ;;  %vm783_vm6 = vmor %vm781_vm5, %vm782_vm4  ;;  %vm802_vm8 = vweird.f32 %v1356_v8  ;;  %v847_v16 = vld [vmem:[#allocation2 + $0xa8] sm:$0xff] }
 0x35b   :  { %v778_v58 = vsub.f32 1.0, %v777_v57  ;;  %vm803_vm10 = vmor %vm801_vm9, %vm802_vm8 }
 0x35c   :  { %v798_v22 = vsub.f32 1.0, %v797_v18 }
 0x35d   :  { %v779_v59 = vmul.f32 %v1354_v30, %v778_v58 }
 0x35e   :  { %v799_v61 = vmul.f32 %v1356_v8, %v798_v22 }
 0x35f   :  { %v780_v63 = vadd.f32 %v1354_v30, %v779_v59 }
 0x360   :  { %v800_v6 = vadd.f32 %v1356_v8, %v799_v61  ;;  %v961_v61 = vld [vmem:[#allocation2 + $0x30] sm:$0xff] }
 0x361   :  { %v784_v2 = vsel %vm783_vm6, %v1354_v30, %v780_v63  ;;  %v964_v63 = vld [vmem:[#allocation2 + $0x70] sm:$0xff] }
 0x362   :  { %v789_v7 = vsel %vm786_vm7, %v788_v0, %v784_v2  ;;  %v804_v25 = vsel %vm803_vm10, %v1356_v8, %v800_v6 }
 0x363   :  { %v831_v11 = vmul.f32 %v829_v4, %v789_v7  ;;  %v809_v28 = vsel %vm806_vm11, %v808_v27, %v804_v25 }
 0x364   :  { %v834_v29 = vsub.f32 1.0, %v809_v28  ;;  %v836_v32 = vmul.f32 %v809_v28, %v1761_v51 }
 0x365   :  { %v832_v24 = vadd.f32 %v831_v11, %v727_v23 }
 0x367   :  { %1357 = vtanh.f32 %v832_v24 }
 0x36d   :  { %v1358_v21 = vpop.eup %1357 }
 0x36e   :  { %v835_v31 = vmul.f32 %v1358_v21, %v834_v29 }
 0x370   :  { %v837_v33 = vadd.f32 %v836_v32, %v835_v31 }
 0x372   :  { %839 = vst.msk [vmem:[#allocation3 + $0x20] sm:$0xff] %vm101_vm1, %v837_v33  ;;  %1286 = vmatmul.msk.f32.vlgmr.msrb.gmra.mxu3 %vm101_vm1, %v837_v33  ;;  %1287 = vmatmul.msk.f32.vlgmr.msrb.gmra.mxu0 %vm101_vm1, %v837_v33 }
 0x373   :  { %1290 = vmatmul.msk.f32.vlgmr.msrb.gmra.mxu1 %vm101_vm1, %v837_v33  ;;  %1183 = vmatpush.msrb.mxu3 %v1495_v10 }
 0x375   :  { %1184 = vmatpush.msrb.mxu3 %v1518_v15 }
 0x377   :  { %1185 = vmatpush.msrb.mxu3 %v1531_v17 }
 0x379   :  { %1186 = vmatpush.msrb.mxu3 %v1545_v19 }
 0x3ef   :  { %v888_v35 = vpop.f32.mrf.mxu0 }
 0x3f0   :  { %v911_v36 = vadd.f32 %v888_v35, %v844_v34  ;;  %v948_v12 = vpop.f32.mrf.mxu1 }
 0x3f1   :  { %v949_v53 = vadd.f32 %v1608_v45, %v948_v12 }
 0x3f2   :  { %v1289_v37 = vmul.f32 -1.442695, %v911_v36 }
 0x3f4   :  { %1359 = vpow2.f32 %v1289_v37 }
 0x3f5   :  { %v868_v39 = vpop.f32.mrf.mxu3 }
 0x3f6   :  { %v891_v40 = vadd.f32 %v868_v39, %v841_v38 }
 0x3f8   :  { %v1288_v41 = vmul.f32 -1.442695, %v891_v40 }
 0x3fa   :  { %v1360_v42 = vpop.eup %1359  ;;  %1361 = vpow2.f32 %v1288_v41 }
 0x3fb   :  { %v915_v43 = vadd.f32 1.0, %v1360_v42 }
 0x3fd   :  { %1363 = vrcp.f32 %v915_v43  ;;  %v927_v55 = vand.u32 2147483648, %v915_v43  ;;  %vm921_vm2 = vweird.f32 %v915_v43  ;;  %v925_v56 = vand.u32 2147483647, %v915_v43 }
 0x3ff   :  { %v928_v57 = vor.u32 1.1754944e-38, %v927_v55  ;;  %vm926_vm4 = vcmp.eq.f32.partialorder %v925_v56, 8.507059e+37 }
 0x400   :  { %v1362_v10 = vpop.eup %1361 }
 0x401   :  { %v895_v44 = vadd.f32 1.0, %v1362_v10 }
 0x403   :  { %1365 = vrcp.f32 %v895_v44  ;;  %v1364_v15 = vpop.eup %1363  ;;  %v907_v49 = vand.u32 2147483648, %v895_v44  ;;  %v905_v51 = vand.u32 2147483647, %v895_v44  ;;  %vm901_vm13 = vweird.f32 %v895_v44 }
 0x404   :  { %v917_v17 = vmul.f32 %v1364_v15, %v915_v43  ;;  %vm922_vm0 = vweird.f32 %v1364_v15 }
 0x405   :  { %v908_v20 = vor.u32 1.1754944e-38, %v907_v49  ;;  %vm906_vm15 = vcmp.eq.f32.partialorder %v905_v51, 8.507059e+37  ;;  %vm923_vm3 = vmor %vm921_vm2, %vm922_vm0  ;;  %v1081_v51 = vld [vmem:[#allocation2 + $0x38] sm:$0xff] }
 0x406   :  { %v918_v47 = vsub.f32 1.0, %v917_v17 }
 0x408   :  { %v919_v1 = vmul.f32 %v1364_v15, %v918_v47 }
 0x409   :  { %v1366_v46 = vpop.eup %1365 }
 0x40a   :  { %v897_v19 = vmul.f32 %v1366_v46, %v895_v44  ;;  %vm902_vm12 = vweird.f32 %v1366_v46  ;;  %v920_v54 = vadd.f32 %v1364_v15, %v919_v1  ;;  %v967_v44 = vld [vmem:[#allocation2 + $0xb0] sm:$0xff] }
 0x40b   :  { %vm903_vm14 = vmor %vm901_vm13, %vm902_vm12 }
 0x40c   :  { %v898_v48 = vsub.f32 1.0, %v897_v19  ;;  %v924_v8 = vsel %vm923_vm3, %v1364_v15, %v920_v54 }
 0x40d   :  { %v929_v18 = vsel %vm926_vm4, %v928_v57, %v924_v8 }
 0x40e   :  { %v899_v50 = vmul.f32 %v1366_v46, %v898_v48  ;;  %v954_v58 = vsub.f32 1.0, %v929_v18  ;;  %v956_v59 = vmul.f32 %v929_v18, %v837_v33 }
 0x410   :  { %v900_v52 = vadd.f32 %v1366_v46, %v899_v50 }
 0x412   :  { %v904_v3 = vsel %vm903_vm14, %v1366_v46, %v900_v52 }
 0x413   :  { %v909_v14 = vsel %vm906_vm15, %v908_v20, %v904_v3  ;;  %v1084_v20 = vld [vmem:[#allocation2 + $0x78] sm:$0xff] }
 0x414   :  { %v951_v5 = vmul.f32 %v949_v53, %v909_v14 }
 0x416   :  { %v952_v30 = vadd.f32 %v951_v5, %v847_v16 }
 0x418   :  { %1367 = vtanh.f32 %v952_v30 }
 0x41e   :  { %v1368_v22 = vpop.eup %1367 }
 0x41f   :  { %v955_v26 = vmul.f32 %v1368_v22, %v954_v58 }
 0x421   :  { %v957_v60 = vadd.f32 %v956_v59, %v955_v26 }
 0x423   :  { %959 = vst.msk [vmem:[#allocation3 + $0x28] sm:$0xff] %vm101_vm1, %v957_v60  ;;  %1291 = vmatmul.msk.f32.vlgmr.msrb.gmra.mxu2 %vm101_vm1, %v957_v60  ;;  %1292 = vmatmul.msk.f32.vlgmr.msra.gmra.mxu3 %vm101_vm1, %v957_v60 }
 0x424   :  { %1295 = vmatmul.msk.f32.vlgmr.msra.gmra.mxu0 %vm101_vm1, %v957_v60 }
 0x4a1   :  { %v1068_v34 = vpop.f32.mrf.mxu0 }
 0x4a2   :  { %v1069_v38 = vadd.f32 %v1608_v45, %v1068_v34 }
 0x4a6   :  { %v988_v62 = vpop.f32.mrf.mxu2  ;;  %v1008_v0 = vpop.f32.mrf.mxu3 }
 0x4a7   :  { %v1011_v2 = vadd.f32 %v988_v62, %v961_v61  ;;  %v1031_v4 = vadd.f32 %v1008_v0, %v964_v63  ;;  %v1389_v0 = vld [vmem:[%s1814_s4] ss:$0 sm:$0xff]  ;;  %s1204_s4 = sshll.u32 %s1417_s25, 4  ;;  %s1205_s4 = int_to_ptr.vmem [resolvable:$true] %s1204_s4 }
 0x4a9   :  { %v1293_v6 = vmul.f32 -1.442695, %v1011_v2  ;;  %v1294_v7 = vmul.f32 -1.442695, %v1031_v4 }
 0x4ab   :  { %1369 = vpow2.f32 %v1293_v6 }
 0x4ac   :  { %1371 = vpow2.f32 %v1294_v7 }
 0x4b1   :  { %v1370_v9 = vpop.eup %1369 }
 0x4b2   :  { %v1372_v11 = vpop.eup %1371  ;;  %v1015_v13 = vadd.f32 1.0, %v1370_v9 }
 0x4b3   :  { %v1035_v23 = vadd.f32 1.0, %v1372_v11 }
 0x4b4   :  { %1373 = vrcp.f32 %v1015_v13  ;;  %v1027_v21 = vand.u32 2147483648, %v1015_v13  ;;  %v1025_v33 = vand.u32 2147483647, %v1015_v13  ;;  %vm1021_vm6 = vweird.f32 %v1015_v13 }
 0x4b5   :  { %1375 = vrcp.f32 %v1035_v23  ;;  %v1047_v43 = vand.u32 2147483648, %v1035_v23  ;;  %vm1041_vm10 = vweird.f32 %v1035_v23  ;;  %v1045_v10 = vand.u32 2147483647, %v1035_v23 }
 0x4b6   :  { %v1028_v37 = vor.u32 1.1754944e-38, %v1027_v21  ;;  %vm1026_vm8 = vcmp.eq.f32.partialorder %v1025_v33, 8.507059e+37 }
 0x4b7   :  { %v1048_v46 = vor.u32 1.1754944e-38, %v1047_v43  ;;  %vm1046_vm12 = vcmp.eq.f32.partialorder %v1045_v10, 8.507059e+37 }
 0x4ba   :  { %v1374_v24 = vpop.eup %1373 }
 0x4bb   :  { %v1376_v25 = vpop.eup %1375  ;;  %v1017_v27 = vmul.f32 %v1374_v24, %v1015_v13  ;;  %vm1022_vm5 = vweird.f32 %v1374_v24  ;;  %v1087_v13 = vld [vmem:[#allocation2 + $0xb8] sm:$0xff] }
 0x4bc   :  { %v1037_v28 = vmul.f32 %v1376_v25, %v1035_v23  ;;  %vm1023_vm7 = vmor %vm1021_vm6, %vm1022_vm5  ;;  %vm1042_vm9 = vweird.f32 %v1376_v25 }
 0x4bd   :  { %v1018_v29 = vsub.f32 1.0, %v1017_v27  ;;  %vm1043_vm11 = vmor %vm1041_vm10, %vm1042_vm9 }
 0x4be   :  { %v1038_v31 = vsub.f32 1.0, %v1037_v28 }
 0x4bf   :  { %v1019_v32 = vmul.f32 %v1374_v24, %v1018_v29 }
 0x4c0   :  { %v1039_v35 = vmul.f32 %v1376_v25, %v1038_v31 }
 0x4c1   :  { %v1020_v36 = vadd.f32 %v1374_v24, %v1019_v32 }
 0x4c2   :  { %v1040_v41 = vadd.f32 %v1376_v25, %v1039_v35 }
 0x4c3   :  { %v1024_v39 = vsel %vm1023_vm7, %v1374_v24, %v1020_v36 }
 0x4c4   :  { %v1029_v40 = vsel %vm1026_vm8, %v1028_v37, %v1024_v39  ;;  %v1044_v17 = vsel %vm1043_vm11, %v1376_v25, %v1040_v41 }
 0x4c5   :  { %v1071_v42 = vmul.f32 %v1069_v38, %v1029_v40  ;;  %v1049_v19 = vsel %vm1046_vm12, %v1048_v46, %v1044_v17 }
 0x4c6   :  { %v1074_v47 = vsub.f32 1.0, %v1049_v19  ;;  %v1076_v49 = vmul.f32 %v1049_v19, %v957_v60 }
 0x4c7   :  { %v1072_v15 = vadd.f32 %v1071_v42, %v967_v44 }
 0x4c9   :  { %1377 = vtanh.f32 %v1072_v15 }
 0x4cf   :  { %v1378_v48 = vpop.eup %1377 }
 0x4d0   :  { %v1075_v45 = vmul.f32 %v1378_v48, %v1074_v47 }
 0x4d2   :  { %v1077_v50 = vadd.f32 %v1076_v49, %v1075_v45 }
 0x4d4   :  { %1079 = vst.msk [vmem:[#allocation3 + $0x30] sm:$0xff] %vm101_vm1, %v1077_v50  ;;  %1296 = vmatmul.msk.f32.vlgmr.msra.gmra.mxu1 %vm101_vm1, %v1077_v50  ;;  %1297 = vmatmul.msk.f32.vlgmr.msra.gmra.mxu2 %vm101_vm1, %v1077_v50 }
 0x4d5   :  { %1300 = vmatmul.msk.f32.vlgmr.msrb.gmra.mxu3 %vm101_vm1, %v1077_v50 }
 0x551   :  { %v1108_v1 = vpop.f32.mrf.mxu1 }
 0x552   :  { %v1131_v12 = vadd.f32 %v1108_v1, %v1081_v51 }
 0x554   :  { %v1298_v52 = vmul.f32 -1.442695, %v1131_v12 }
 0x556   :  { %1379 = vpow2.f32 %v1298_v52 }
 0x557   :  { %v1128_v53 = vpop.f32.mrf.mxu2 }
 0x558   :  { %v1151_v3 = vadd.f32 %v1128_v53, %v1084_v20  ;;  %v1188_v26 = vpop.f32.mrf.mxu3 }
 0x559   :  { %v1189_v2 = vadd.f32 %v1389_v0, %v1188_v26 }
 0x55a   :  { %v1299_v54 = vmul.f32 -1.442695, %v1151_v3 }
 0x55c   :  { %v1380_v14 = vpop.eup %1379  ;;  %1381 = vpow2.f32 %v1299_v54 }
 0x55d   :  { %v1135_v55 = vadd.f32 1.0, %v1380_v14 }
 0x55f   :  { %1383 = vrcp.f32 %v1135_v55  ;;  %v1147_v57 = vand.u32 2147483648, %v1135_v55  ;;  %v1145_v58 = vand.u32 2147483647, %v1135_v55  ;;  %vm1141_vm14 = vweird.f32 %v1135_v55 }
 0x561   :  { %v1148_v61 = vor.u32 1.1754944e-38, %v1147_v57  ;;  %vm1146_vm0 = vcmp.eq.f32.partialorder %v1145_v58, 8.507059e+37 }
 0x562   :  { %v1382_v5 = vpop.eup %1381 }
 0x563   :  { %v1155_v56 = vadd.f32 1.0, %v1382_v5 }
 0x565   :  { %v1384_v16 = vpop.eup %1383  ;;  %1385 = vrcp.f32 %v1155_v56  ;;  %v1167_v7 = vand.u32 2147483648, %v1155_v56  ;;  %v1165_v11 = vand.u32 2147483647, %v1155_v56  ;;  %vm1161_vm3 = vweird.f32 %v1155_v56 }
 0x566   :  { %v1137_v30 = vmul.f32 %v1384_v16, %v1135_v55  ;;  %vm1142_vm13 = vweird.f32 %v1384_v16 }
 0x567   :  { %vm1143_vm15 = vmor %vm1141_vm14, %vm1142_vm13  ;;  %v1168_v25 = vor.u32 1.1754944e-38, %v1167_v7  ;;  %vm1166_vm5 = vcmp.eq.f32.partialorder %v1165_v11, 8.507059e+37 }
 0x568   :  { %v1138_v8 = vsub.f32 1.0, %v1137_v30 }
 0x56a   :  { %v1139_v18 = vmul.f32 %v1384_v16, %v1138_v8 }
 0x56b   :  { %v1386_v22 = vpop.eup %1385 }
 0x56c   :  { %v1157_v59 = vmul.f32 %v1386_v22, %v1155_v56  ;;  %v1140_v60 = vadd.f32 %v1384_v16, %v1139_v18  ;;  %vm1162_vm2 = vweird.f32 %v1386_v22 }
 0x56d   :  { %vm1163_vm4 = vmor %vm1161_vm3, %vm1162_vm2 }
 0x56e   :  { %v1158_v62 = vsub.f32 1.0, %v1157_v59  ;;  %v1144_v63 = vsel %vm1143_vm15, %v1384_v16, %v1140_v60 }
 0x56f   :  { %v1149_v4 = vsel %vm1146_vm0, %v1148_v61, %v1144_v63 }
 0x570   :  { %v1159_v6 = vmul.f32 %v1386_v22, %v1158_v62  ;;  %v1191_v9 = vmul.f32 %v1189_v2, %v1149_v4 }
 0x572   :  { %v1160_v23 = vadd.f32 %v1386_v22, %v1159_v6  ;;  %v1192_v24 = vadd.f32 %v1191_v9, %v1087_v13 }
 0x574   :  { %v1164_v27 = vsel %vm1163_vm4, %v1386_v22, %v1160_v23  ;;  %1387 = vtanh.f32 %v1192_v24 }
 0x575   :  { %v1169_v28 = vsel %vm1166_vm5, %v1168_v25, %v1164_v27 }
 0x576   :  { %v1194_v29 = vsub.f32 1.0, %v1169_v28  ;;  %v1196_v32 = vmul.f32 %v1169_v28, %v1077_v50 }
 0x57a   :  { %v1388_v21 = vpop.eup %1387 }
 0x57b   :  { %v1195_v31 = vmul.f32 %v1388_v21, %v1194_v29 }
 0x57d   :  { %v1197_v33 = vadd.f32 %v1196_v32, %v1195_v31 }
 0x57f   :  { %1199 = vst.msk [vmem:[#allocation3 + $0x38] sm:$0xff] %vm101_vm1, %v1197_v33 }
 0x580   :  { %1212 = dma.vmem_to_hbm [thread:$0]  %s1205_s4, 1024, %s1207_s28, [#allocation4], %s1418_s29, %s1418_s29, %s1419_s2  }
 0x581   :  { %1414 = dma.done.wait [#allocation4], 1024  }
 0x582   :  { %1415 = vsyncadd [#allocation4], 4294966272 }
 0x583   :  { %1217 = vsyncpa [#allocation4], 1 }

</bundles_post_ra>
